<compile_context>
chip_gen: v5e
topology: v5e:2x2
jax: 0.10.0
libtpu: 0.0.40
codegen_flags: <defaults>
</compile_context>

<pallas_src>
import numpy as np
import jax
import jax.numpy as jnp
from jax import lax
from jax.experimental import pallas as pl
from jax.experimental.pallas import tpu as pltpu


def _round_up(v, m):
    return (v + m - 1) // m * m


def _pick_nb(n, per_item_padded_bytes, target_bytes):
    """Batch elements folded into one grid step.

    Sized against the (8,128)-padded VMEM footprint; capped so the parallel
    batch axis keeps >= 2 grid steps when possible (v7x has 2 TensorCores).
    """
    nb = max(1, min(n, int(target_bytes // max(per_item_padded_bytes, 1))))
    if n >= 2:
        nb = max(1, min(nb, n // 2))
    while n % nb:            # uniform blocks only (perf-only fallback, prime N)
        nb -= 1
    return nb


# --------------------------------------------------------------------------
# Fast path: factored weight  w[c, kh, kw] = u[c] * s[kh, kw]
# --------------------------------------------------------------------------
def _restriction_fast_kernel(u_ref, x_ref, a_ref, m_ref, o_ref):
    """u_ref: (C,) f32 SMEM; x_ref: (nb,C,H,W) raw NCHW VMEM;
    a_ref: (3,Ho,H) row-selection A[kh,a,h] = [h == 2a+kh];
    m_ref: (3,W,Wo) banded column stencil M[kh,2b+kw,b] = s[kh,kw];
    o_ref: (nb,Ho,Wo)."""
    nb, C, _, _ = x_ref.shape

    # Loop-invariant loads hoisted once (scalars off SMEM, small mats off VMEM).
    u = [u_ref[c] for c in range(C)]
    a_mats = [a_ref[kh] for kh in range(3)]
    m_mats = [m_ref[kh] for kh in range(3)]

    def one_image(n):
        # Channel reduction on the VPU; every channel slice loaded exactly once.
        y = x_ref[n, 0, :, :] * u[0]
        for c in range(1, C):
            y = y + x_ref[n, c, :, :] * u[c]
        # 3x3 stride-2 stencil as 3 (row-select, column-stencil) matmul pairs
        # on the otherwise-idle MXU: out = sum_kh A_kh @ y @ M_kh.
        acc = None
        for kh in range(3):
            rows = jnp.dot(a_mats[kh], y, preferred_element_type=jnp.float32)
            part = jnp.dot(rows, m_mats[kh], preferred_element_type=jnp.float32)
            acc = part if acc is None else acc + part
        o_ref[n, :, :] = acc.astype(o_ref.dtype)

    if nb <= 8:                       # short static loop -> unrolled
        for n in range(nb):
            one_image(n)
    else:
        def body(n, carry):
            one_image(n)
            return carry
        lax.fori_loop(0, nb, body, 0)


def _restriction_fast(x, s_np, u_np):
    N, C, H, W = x.shape
    Ho, Wo = (H - 3) // 2 + 1, (W - 3) // 2 + 1

    # Row-selection matrices: A[kh, a, 2a+kh] = 1.
    a_mat = np.zeros((3, Ho, H), np.float32)
    ai = np.arange(Ho)
    for kh in range(3):
        a_mat[kh, ai, 2 * ai + kh] = 1.0
    # Banded column-stencil matrices: M[kh, 2b+kw, b] = s[kh, kw].
    m_mat = np.zeros((3, W, Wo), np.float32)
    bi = np.arange(Wo)
    for kh in range(3):
        for kw in range(3):
            m_mat[kh, 2 * bi + kw, bi] = s_np[kh, kw]

    itemsize = 4
    per_item = C * _round_up(H, 8) * _round_up(W, 128) * itemsize       # padded
    nb = _pick_nb(N, per_item, target_bytes=8 << 20)
    out_blk = nb * _round_up(Ho, 8) * _round_up(Wo, 128) * itemsize
    aux = (3 * _round_up(Ho, 8) * _round_up(H, 128)
           + 3 * _round_up(W, 8) * _round_up(Wo, 128)) * itemsize
    est = 2 * (nb * per_item + out_blk + aux) + (4 << 20)   # double-buffered
    vmem_limit = int(min(56 << 20, max(32 << 20, est)))

    out = pl.pallas_call(
        _restriction_fast_kernel,
        out_shape=jax.ShapeDtypeStruct((N, Ho, Wo), x.dtype),
        grid=(N // nb,),
        in_specs=[
            pl.BlockSpec(memory_space=pltpu.MemorySpace.SMEM),           # u[c]
            pl.BlockSpec((nb, C, H, W), lambda b: (b, 0, 0, 0)),         # raw x
            pl.BlockSpec((3, Ho, H), lambda b: (0, 0, 0)),               # A
            pl.BlockSpec((3, W, Wo), lambda b: (0, 0, 0)),               # M
        ],
        out_specs=pl.BlockSpec((nb, Ho, Wo), lambda b: (b, 0, 0)),
        compiler_params=pltpu.CompilerParams(
            dimension_semantics=("parallel",),
            vmem_limit_bytes=vmem_limit),
    )(jnp.asarray(u_np), x, jnp.asarray(a_mat), jnp.asarray(m_mat))
    return out[:, None, :, :]


# --------------------------------------------------------------------------
# General path: arbitrary per-channel 3x3 weights (parity-plane VPU kernel)
# --------------------------------------------------------------------------
def _restriction_general_kernel(w_ref, planes_ref, o_ref):
    """w_ref: (9*C,) f32 SMEM, index (kh*3+kw)*C + c;
    planes_ref: (nb, 4*C, Hh, Wh) with channel (rh*2+rw)*C + c where
    plane[n,(rh*2+rw)*C+c,a,b] = x[n,c,2a+rh,2b+rw]; o_ref: (nb, Ho, Wo)."""
    _, pc, _, _ = planes_ref.shape
    C = pc // 4
    Ho, Wo = o_ref.shape[1], o_ref.shape[2]

    acc = None
    # Parity-plane outer / taps-on-that-plane inner: every plane-channel slice
    # is loaded exactly once (64 loads total, was ~144).
    for rh in range(2):
        for rw in range(2):
            p = rh * 2 + rw
            taps = [(kh, kw) for kh in range(3) for kw in range(3)
                    if kh % 2 == rh and kw % 2 == rw]
            partial = [None] * len(taps)
            for c in range(C):
                v = planes_ref[:, p * C + c, :, :].astype(jnp.float32)
                for ti, (kh, kw) in enumerate(taps):
                    wk = w_ref[(kh * 3 + kw) * C + c]        # SMEM scalar
                    term = v * wk
                    partial[ti] = term if partial[ti] is None else partial[ti] + term
            # One shifted slice per tap (hoisted out of the channel loop).
            for ti, (kh, kw) in enumerate(taps):
                dh, dw = kh // 2, kw // 2
                sl = partial[ti][:, dh:dh + Ho, dw:dw + Wo]
                acc = sl if acc is None else acc + sl
    o_ref[...] = acc.astype(o_ref.dtype)


def _restriction_general(x, weight):
    N, C, H, W = x.shape
    assert H % 2 == 0 and W % 2 == 0, "general path expects even H, W"
    Hh, Wh = H // 2, W // 2
    Ho, Wo = Hh - 1, Wh - 1           # == (H-3)//2 + 1 for even H, W

    # TODO(synk): this stride-2 parity relayout is a full extra HBM pass; keep
    # the plane-major layout persistent across multigrid levels / fuse it into
    # the producer instead of paying it here.
    xr = x.reshape(N, C, Hh, 2, Wh, 2)
    planes = jnp.transpose(xr, (0, 3, 5, 1, 2, 4)).reshape(N, 4 * C, Hh, Wh)
    w_flat = jnp.transpose(weight[0].astype(jnp.float32), (1, 2, 0)).reshape(9 * C)

    itemsize = 4
    per_item = 4 * C * _round_up(Hh, 8) * _round_up(Wh, 128) * itemsize  # padded
    nb = _pick_nb(N, per_item, target_bytes=8 << 20)
    out_blk = nb * _round_up(Ho, 8) * _round_up(Wo, 128) * itemsize
    est = 2 * (nb * per_item + out_blk) + (4 << 20)
    vmem_limit = int(min(56 << 20, max(32 << 20, est)))

    out = pl.pallas_call(
        _restriction_general_kernel,
        out_shape=jax.ShapeDtypeStruct((N, Ho, Wo), x.dtype),
        grid=(N // nb,),
        in_specs=[
            pl.BlockSpec(memory_space=pltpu.MemorySpace.SMEM),            # weights
            pl.BlockSpec((nb, 4 * C, Hh, Wh), lambda b: (b, 0, 0, 0)),
        ],
        out_specs=pl.BlockSpec((nb, Ho, Wo), lambda b: (b, 0, 0)),
        compiler_params=pltpu.CompilerParams(
            dimension_semantics=("parallel",),
            vmem_limit_bytes=vmem_limit),
    )(w_flat, planes)
    return out[:, None, :, :]


# --------------------------------------------------------------------------
# Wrapper: RestrictionNet.forward
# --------------------------------------------------------------------------
def _try_factor_weight(weight, tol=1e-6):
    """Return (s (3,3), u (C,)) with weight[0,c,kh,kw] == u[c]*s[kh,kw], else None.

    Needs concrete weights; returns None under tracing (-> general path).
    """
    try:
        w = np.asarray(jax.device_get(weight), dtype=np.float64)
    except Exception:
        return None
    c_in = w.shape[1]
    wm = w.reshape(c_in, 9)
    c0 = int(np.argmax(np.sum(wm * wm, axis=1)))
    s = wm[c0]
    denom = float(np.dot(s, s))
    if denom == 0.0:                        # all-zero weight: trivially factored
        return np.zeros((3, 3), np.float32), np.zeros((c_in,), np.float32)
    u = wm @ s / denom
    scale = max(1.0, float(np.abs(wm).max()))
    if not np.allclose(wm, np.outer(u, s), rtol=0.0, atol=tol * scale):
        return None
    return s.reshape(3, 3).astype(np.float32), u.astype(np.float32)


def restriction_net(x, weight):
    """Pallas equivalent of RestrictionNet.forward.

    x      : (N, 16, H, W) NCHW
    weight : (1, 16, 3, 3) Conv2d weight (out, in, kh, kw)
    returns: (N, 1, Ho, Wo) with Ho = (H-3)//2 + 1, Wo = (W-3)//2 + 1
    """
    x = jnp.asarray(x)
    if x.dtype != jnp.float32:
        x = x.astype(jnp.float32)
    N, C, H, W = x.shape
    assert C == 16 and H >= 3 and W >= 3
    Ho, Wo = (H - 3) // 2 + 1, (W - 3) // 2 + 1

    factored = _try_factor_weight(weight)
    if factored is not None:
        s_np, u_np = factored
        # Guard: A/M selection matrices are O(H*Ho)/O(W*Wo); only take the MXU
        # fast path while their padded footprint stays small.
        aux = (3 * _round_up(Ho, 8) * _round_up(H, 128)
               + 3 * _round_up(W, 8) * _round_up(Wo, 128)) * 4
        if aux <= (8 << 20):
            try:
                return _restriction_fast(x, s_np, u_np)
            except Exception:
                # Conservative fallback: the general path is semantically
                # identical if the fast path fails to lower on this backend.
                pass
    return _restriction_general(x, weight)


if __name__ == "__main__":
    key = jax.random.PRNGKey(0)
    kx, kw2 = jax.random.split(key)
    N, C, H, W = 2, 16, 16, 16
    x_split = jax.random.normal(kx, (N, C, H, W), dtype=jnp.float32)

    # RestrictionNet weight: the classic full-weighting restriction stencil
    # copied into all 16 input channels (factored -> exercises the MXU path).
    linear_tensor_R = jnp.array([[1.0, 2.0, 1.0],
                                 [2.0, 4.0, 2.0],
                                 [1.0, 2.0, 1.0]], jnp.float32) / 16.0
    weight = jnp.tile(linear_tensor_R[None, None, :, :], (1, C, 1, 1))

    y = jax.block_until_ready(restriction_net(x_split, weight))
    ref = jax.lax.conv_general_dilated(
        x_split, weight, window_strides=(2, 2), padding="VALID",
        dimension_numbers=("NCHW", "OIHW", "NCHW"))
    assert y.shape == ref.shape == (N, 1, (H - 3) // 2 + 1, (W - 3) // 2 + 1)
    # The fast path routes two small matmuls through the MXU, whose f32
    # handling may use multi-pass bf16; tolerance is set accordingly (a real
    # indexing/scale bug would produce O(1) errors, still caught here).
    np.testing.assert_allclose(np.asarray(y), np.asarray(ref),
                               rtol=2e-2, atol=2e-2)

    # General (non-factored weight) fallback path: pure f32 VPU math.
    weight_g = jax.random.normal(kw2, (1, C, 3, 3), dtype=jnp.float32)
    y_g = jax.block_until_ready(restriction_net(x_split, weight_g))
    ref_g = jax.lax.conv_general_dilated(
        x_split, weight_g, window_strides=(2, 2), padding="VALID",
        dimension_numbers=("NCHW", "OIHW", "NCHW"))
    np.testing.assert_allclose(np.asarray(y_g), np.asarray(ref_g),
                               rtol=1e-4, atol=1e-4)

    print("KERNEL_OK")
</pallas_src>

<mosaic_0001>
module attributes {stable_mosaic.version = 11 : i64} {
  func.func @_restriction_fast_kernel(%arg0: i32, %arg1: memref<16xf32, #tpu.memory_space<smem>>, %arg2: memref<1x16x16x16xf32, #tpu.memory_space<vmem>>, %arg3: memref<3x7x16xf32, #tpu.memory_space<vmem>>, %arg4: memref<3x16x7xf32, #tpu.memory_space<vmem>>, %arg5: memref<1x7x7xf32, #tpu.memory_space<vmem>>) attributes {dimension_semantics = [#tpu.dimension_semantics<parallel>], iteration_bounds = array<i64: 2>, scalar_prefetch = 0 : i64, scratch_operands = 0 : i64, tpu.core_type = #tpu.core_type<tc>, window_params = [{transform_indices = @transform_0, window_bounds = array<i64: 16>}, {transform_indices = @transform_1, window_bounds = array<i64: 1, 16, 16, 16>}, {pipeline_mode = #tpu.pipeline_mode<synchronous>, transform_indices = @transform_2, window_bounds = array<i64: 3, 7, 16>}, {pipeline_mode = #tpu.pipeline_mode<synchronous>, transform_indices = @transform_3, window_bounds = array<i64: 3, 16, 7>}, {transform_indices = @transform_4, window_bounds = array<i64: 1, 7, 7>}]} {
    %c0 = arith.constant 0 : index
    %0 = memref.load %arg1[%c0] : memref<16xf32, #tpu.memory_space<smem>>
    %c1 = arith.constant 1 : index
    %1 = memref.load %arg1[%c1] : memref<16xf32, #tpu.memory_space<smem>>
    %c2 = arith.constant 2 : index
    %2 = memref.load %arg1[%c2] : memref<16xf32, #tpu.memory_space<smem>>
    %c3 = arith.constant 3 : index
    %3 = memref.load %arg1[%c3] : memref<16xf32, #tpu.memory_space<smem>>
    %c4 = arith.constant 4 : index
    %4 = memref.load %arg1[%c4] : memref<16xf32, #tpu.memory_space<smem>>
    %c5 = arith.constant 5 : index
    %5 = memref.load %arg1[%c5] : memref<16xf32, #tpu.memory_space<smem>>
    %c6 = arith.constant 6 : index
    %6 = memref.load %arg1[%c6] : memref<16xf32, #tpu.memory_space<smem>>
    %c7 = arith.constant 7 : index
    %7 = memref.load %arg1[%c7] : memref<16xf32, #tpu.memory_space<smem>>
    %c8 = arith.constant 8 : index
    %8 = memref.load %arg1[%c8] : memref<16xf32, #tpu.memory_space<smem>>
    %c9 = arith.constant 9 : index
    %9 = memref.load %arg1[%c9] : memref<16xf32, #tpu.memory_space<smem>>
    %c10 = arith.constant 10 : index
    %10 = memref.load %arg1[%c10] : memref<16xf32, #tpu.memory_space<smem>>
    %c11 = arith.constant 11 : index
    %11 = memref.load %arg1[%c11] : memref<16xf32, #tpu.memory_space<smem>>
    %c12 = arith.constant 12 : index
    %12 = memref.load %arg1[%c12] : memref<16xf32, #tpu.memory_space<smem>>
    %c13 = arith.constant 13 : index
    %13 = memref.load %arg1[%c13] : memref<16xf32, #tpu.memory_space<smem>>
    %c14 = arith.constant 14 : index
    %14 = memref.load %arg1[%c14] : memref<16xf32, #tpu.memory_space<smem>>
    %c15 = arith.constant 15 : index
    %15 = memref.load %arg1[%c15] : memref<16xf32, #tpu.memory_space<smem>>
    %c0_0 = arith.constant 0 : index
    %c0_1 = arith.constant 0 : index
    %c0_2 = arith.constant 0 : index
    %16 = vector.load %arg3[%c0_0, %c0_1, %c0_2] : memref<3x7x16xf32, #tpu.memory_space<vmem>>, vector<1x7x16xf32>
    %17 = vector.shape_cast %16 : vector<1x7x16xf32> to vector<7x16xf32>
    %c1_3 = arith.constant 1 : index
    %c0_4 = arith.constant 0 : index
    %c0_5 = arith.constant 0 : index
    %18 = vector.load %arg3[%c1_3, %c0_4, %c0_5] : memref<3x7x16xf32, #tpu.memory_space<vmem>>, vector<1x7x16xf32>
    %19 = vector.shape_cast %18 : vector<1x7x16xf32> to vector<7x16xf32>
    %c2_6 = arith.constant 2 : index
    %c0_7 = arith.constant 0 : index
    %c0_8 = arith.constant 0 : index
    %20 = vector.load %arg3[%c2_6, %c0_7, %c0_8] : memref<3x7x16xf32, #tpu.memory_space<vmem>>, vector<1x7x16xf32>
    %21 = vector.shape_cast %20 : vector<1x7x16xf32> to vector<7x16xf32>
    %c0_9 = arith.constant 0 : index
    %c0_10 = arith.constant 0 : index
    %c0_11 = arith.constant 0 : index
    %22 = vector.load %arg4[%c0_9, %c0_10, %c0_11] : memref<3x16x7xf32, #tpu.memory_space<vmem>>, vector<1x16x7xf32>
    %23 = vector.shape_cast %22 : vector<1x16x7xf32> to vector<16x7xf32>
    %c1_12 = arith.constant 1 : index
    %c0_13 = arith.constant 0 : index
    %c0_14 = arith.constant 0 : index
    %24 = vector.load %arg4[%c1_12, %c0_13, %c0_14] : memref<3x16x7xf32, #tpu.memory_space<vmem>>, vector<1x16x7xf32>
    %25 = vector.shape_cast %24 : vector<1x16x7xf32> to vector<16x7xf32>
    %c2_15 = arith.constant 2 : index
    %c0_16 = arith.constant 0 : index
    %c0_17 = arith.constant 0 : index
    %26 = vector.load %arg4[%c2_15, %c0_16, %c0_17] : memref<3x16x7xf32, #tpu.memory_space<vmem>>, vector<1x16x7xf32>
    %27 = vector.shape_cast %26 : vector<1x16x7xf32> to vector<16x7xf32>
    %c0_18 = arith.constant 0 : index
    %c0_19 = arith.constant 0 : index
    %c0_20 = arith.constant 0 : index
    %c0_21 = arith.constant 0 : index
    %28 = vector.load %arg2[%c0_18, %c0_19, %c0_20, %c0_21] : memref<1x16x16x16xf32, #tpu.memory_space<vmem>>, vector<1x1x16x16xf32>
    %29 = vector.shape_cast %28 : vector<1x1x16x16xf32> to vector<16x16xf32>
    %30 = vector.broadcast %0 : f32 to vector<16x16xf32>
    %31 = arith.mulf %29, %30 : vector<16x16xf32>
    %c0_22 = arith.constant 0 : index
    %c1_23 = arith.constant 1 : index
    %c0_24 = arith.constant 0 : index
    %c0_25 = arith.constant 0 : index
    %32 = vector.load %arg2[%c0_22, %c1_23, %c0_24, %c0_25] : memref<1x16x16x16xf32, #tpu.memory_space<vmem>>, vector<1x1x16x16xf32>
    %33 = vector.shape_cast %32 : vector<1x1x16x16xf32> to vector<16x16xf32>
    %34 = vector.broadcast %1 : f32 to vector<16x16xf32>
    %35 = arith.mulf %33, %34 : vector<16x16xf32>
    %36 = arith.addf %31, %35 : vector<16x16xf32>
    %c0_26 = arith.constant 0 : index
    %c2_27 = arith.constant 2 : index
    %c0_28 = arith.constant 0 : index
    %c0_29 = arith.constant 0 : index
    %37 = vector.load %arg2[%c0_26, %c2_27, %c0_28, %c0_29] : memref<1x16x16x16xf32, #tpu.memory_space<vmem>>, vector<1x1x16x16xf32>
    %38 = vector.shape_cast %37 : vector<1x1x16x16xf32> to vector<16x16xf32>
    %39 = vector.broadcast %2 : f32 to vector<16x16xf32>
    %40 = arith.mulf %38, %39 : vector<16x16xf32>
    %41 = arith.addf %36, %40 : vector<16x16xf32>
    %c0_30 = arith.constant 0 : index
    %c3_31 = arith.constant 3 : index
    %c0_32 = arith.constant 0 : index
    %c0_33 = arith.constant 0 : index
    %42 = vector.load %arg2[%c0_30, %c3_31, %c0_32, %c0_33] : memref<1x16x16x16xf32, #tpu.memory_space<vmem>>, vector<1x1x16x16xf32>
    %43 = vector.shape_cast %42 : vector<1x1x16x16xf32> to vector<16x16xf32>
    %44 = vector.broadcast %3 : f32 to vector<16x16xf32>
    %45 = arith.mulf %43, %44 : vector<16x16xf32>
    %46 = arith.addf %41, %45 : vector<16x16xf32>
    %c0_34 = arith.constant 0 : index
    %c4_35 = arith.constant 4 : index
    %c0_36 = arith.constant 0 : index
    %c0_37 = arith.constant 0 : index
    %47 = vector.load %arg2[%c0_34, %c4_35, %c0_36, %c0_37] : memref<1x16x16x16xf32, #tpu.memory_space<vmem>>, vector<1x1x16x16xf32>
    %48 = vector.shape_cast %47 : vector<1x1x16x16xf32> to vector<16x16xf32>
    %49 = vector.broadcast %4 : f32 to vector<16x16xf32>
    %50 = arith.mulf %48, %49 : vector<16x16xf32>
    %51 = arith.addf %46, %50 : vector<16x16xf32>
    %c0_38 = arith.constant 0 : index
    %c5_39 = arith.constant 5 : index
    %c0_40 = arith.constant 0 : index
    %c0_41 = arith.constant 0 : index
    %52 = vector.load %arg2[%c0_38, %c5_39, %c0_40, %c0_41] : memref<1x16x16x16xf32, #tpu.memory_space<vmem>>, vector<1x1x16x16xf32>
    %53 = vector.shape_cast %52 : vector<1x1x16x16xf32> to vector<16x16xf32>
    %54 = vector.broadcast %5 : f32 to vector<16x16xf32>
    %55 = arith.mulf %53, %54 : vector<16x16xf32>
    %56 = arith.addf %51, %55 : vector<16x16xf32>
    %c0_42 = arith.constant 0 : index
    %c6_43 = arith.constant 6 : index
    %c0_44 = arith.constant 0 : index
    %c0_45 = arith.constant 0 : index
    %57 = vector.load %arg2[%c0_42, %c6_43, %c0_44, %c0_45] : memref<1x16x16x16xf32, #tpu.memory_space<vmem>>, vector<1x1x16x16xf32>
    %58 = vector.shape_cast %57 : vector<1x1x16x16xf32> to vector<16x16xf32>
    %59 = vector.broadcast %6 : f32 to vector<16x16xf32>
    %60 = arith.mulf %58, %59 : vector<16x16xf32>
    %61 = arith.addf %56, %60 : vector<16x16xf32>
    %c0_46 = arith.constant 0 : index
    %c7_47 = arith.constant 7 : index
    %c0_48 = arith.constant 0 : index
    %c0_49 = arith.constant 0 : index
    %62 = vector.load %arg2[%c0_46, %c7_47, %c0_48, %c0_49] : memref<1x16x16x16xf32, #tpu.memory_space<vmem>>, vector<1x1x16x16xf32>
    %63 = vector.shape_cast %62 : vector<1x1x16x16xf32> to vector<16x16xf32>
    %64 = vector.broadcast %7 : f32 to vector<16x16xf32>
    %65 = arith.mulf %63, %64 : vector<16x16xf32>
    %66 = arith.addf %61, %65 : vector<16x16xf32>
    %c0_50 = arith.constant 0 : index
    %c8_51 = arith.constant 8 : index
    %c0_52 = arith.constant 0 : index
    %c0_53 = arith.constant 0 : index
    %67 = vector.load %arg2[%c0_50, %c8_51, %c0_52, %c0_53] : memref<1x16x16x16xf32, #tpu.memory_space<vmem>>, vector<1x1x16x16xf32>
    %68 = vector.shape_cast %67 : vector<1x1x16x16xf32> to vector<16x16xf32>
    %69 = vector.broadcast %8 : f32 to vector<16x16xf32>
    %70 = arith.mulf %68, %69 : vector<16x16xf32>
    %71 = arith.addf %66, %70 : vector<16x16xf32>
    %c0_54 = arith.constant 0 : index
    %c9_55 = arith.constant 9 : index
    %c0_56 = arith.constant 0 : index
    %c0_57 = arith.constant 0 : index
    %72 = vector.load %arg2[%c0_54, %c9_55, %c0_56, %c0_57] : memref<1x16x16x16xf32, #tpu.memory_space<vmem>>, vector<1x1x16x16xf32>
    %73 = vector.shape_cast %72 : vector<1x1x16x16xf32> to vector<16x16xf32>
    %74 = vector.broadcast %9 : f32 to vector<16x16xf32>
    %75 = arith.mulf %73, %74 : vector<16x16xf32>
    %76 = arith.addf %71, %75 : vector<16x16xf32>
    %c0_58 = arith.constant 0 : index
    %c10_59 = arith.constant 10 : index
    %c0_60 = arith.constant 0 : index
    %c0_61 = arith.constant 0 : index
    %77 = vector.load %arg2[%c0_58, %c10_59, %c0_60, %c0_61] : memref<1x16x16x16xf32, #tpu.memory_space<vmem>>, vector<1x1x16x16xf32>
    %78 = vector.shape_cast %77 : vector<1x1x16x16xf32> to vector<16x16xf32>
    %79 = vector.broadcast %10 : f32 to vector<16x16xf32>
    %80 = arith.mulf %78, %79 : vector<16x16xf32>
    %81 = arith.addf %76, %80 : vector<16x16xf32>
    %c0_62 = arith.constant 0 : index
    %c11_63 = arith.constant 11 : index
    %c0_64 = arith.constant 0 : index
    %c0_65 = arith.constant 0 : index
    %82 = vector.load %arg2[%c0_62, %c11_63, %c0_64, %c0_65] : memref<1x16x16x16xf32, #tpu.memory_space<vmem>>, vector<1x1x16x16xf32>
    %83 = vector.shape_cast %82 : vector<1x1x16x16xf32> to vector<16x16xf32>
    %84 = vector.broadcast %11 : f32 to vector<16x16xf32>
    %85 = arith.mulf %83, %84 : vector<16x16xf32>
    %86 = arith.addf %81, %85 : vector<16x16xf32>
    %c0_66 = arith.constant 0 : index
    %c12_67 = arith.constant 12 : index
    %c0_68 = arith.constant 0 : index
    %c0_69 = arith.constant 0 : index
    %87 = vector.load %arg2[%c0_66, %c12_67, %c0_68, %c0_69] : memref<1x16x16x16xf32, #tpu.memory_space<vmem>>, vector<1x1x16x16xf32>
    %88 = vector.shape_cast %87 : vector<1x1x16x16xf32> to vector<16x16xf32>
    %89 = vector.broadcast %12 : f32 to vector<16x16xf32>
    %90 = arith.mulf %88, %89 : vector<16x16xf32>
    %91 = arith.addf %86, %90 : vector<16x16xf32>
    %c0_70 = arith.constant 0 : index
    %c13_71 = arith.constant 13 : index
    %c0_72 = arith.constant 0 : index
    %c0_73 = arith.constant 0 : index
    %92 = vector.load %arg2[%c0_70, %c13_71, %c0_72, %c0_73] : memref<1x16x16x16xf32, #tpu.memory_space<vmem>>, vector<1x1x16x16xf32>
    %93 = vector.shape_cast %92 : vector<1x1x16x16xf32> to vector<16x16xf32>
    %94 = vector.broadcast %13 : f32 to vector<16x16xf32>
    %95 = arith.mulf %93, %94 : vector<16x16xf32>
    %96 = arith.addf %91, %95 : vector<16x16xf32>
    %c0_74 = arith.constant 0 : index
    %c14_75 = arith.constant 14 : index
    %c0_76 = arith.constant 0 : index
    %c0_77 = arith.constant 0 : index
    %97 = vector.load %arg2[%c0_74, %c14_75, %c0_76, %c0_77] : memref<1x16x16x16xf32, #tpu.memory_space<vmem>>, vector<1x1x16x16xf32>
    %98 = vector.shape_cast %97 : vector<1x1x16x16xf32> to vector<16x16xf32>
    %99 = vector.broadcast %14 : f32 to vector<16x16xf32>
    %100 = arith.mulf %98, %99 : vector<16x16xf32>
    %101 = arith.addf %96, %100 : vector<16x16xf32>
    %c0_78 = arith.constant 0 : index
    %c15_79 = arith.constant 15 : index
    %c0_80 = arith.constant 0 : index
    %c0_81 = arith.constant 0 : index
    %102 = vector.load %arg2[%c0_78, %c15_79, %c0_80, %c0_81] : memref<1x16x16x16xf32, #tpu.memory_space<vmem>>, vector<1x1x16x16xf32>
    %103 = vector.shape_cast %102 : vector<1x1x16x16xf32> to vector<16x16xf32>
    %104 = vector.broadcast %15 : f32 to vector<16x16xf32>
    %105 = arith.mulf %103, %104 : vector<16x16xf32>
    %106 = arith.addf %101, %105 : vector<16x16xf32>
    %cst = arith.constant dense<0.000000e+00> : vector<7x16xf32>
    %107 = tpu.matmul %17, %106, %cst {dimension_numbers = #tpu.dot_dimension_numbers<[1], [0], [0], [1], [0, 0, 1, 1], [], []>} : vector<7x16xf32>, vector<16x16xf32>, vector<7x16xf32> -> vector<7x16xf32>
    %cst_82 = arith.constant dense<0.000000e+00> : vector<7x7xf32>
    %108 = tpu.matmul %107, %23, %cst_82 {dimension_numbers = #tpu.dot_dimension_numbers<[1], [0], [0], [1], [0, 0, 1, 1], [], []>} : vector<7x16xf32>, vector<16x7xf32>, vector<7x7xf32> -> vector<7x7xf32>
    %cst_83 = arith.constant dense<0.000000e+00> : vector<7x16xf32>
    %109 = tpu.matmul %19, %106, %cst_83 {dimension_numbers = #tpu.dot_dimension_numbers<[1], [0], [0], [1], [0, 0, 1, 1], [], []>} : vector<7x16xf32>, vector<16x16xf32>, vector<7x16xf32> -> vector<7x16xf32>
    %cst_84 = arith.constant dense<0.000000e+00> : vector<7x7xf32>
    %110 = tpu.matmul %109, %25, %cst_84 {dimension_numbers = #tpu.dot_dimension_numbers<[1], [0], [0], [1], [0, 0, 1, 1], [], []>} : vector<7x16xf32>, vector<16x7xf32>, vector<7x7xf32> -> vector<7x7xf32>
    %111 = arith.addf %108, %110 : vector<7x7xf32>
    %cst_85 = arith.constant dense<0.000000e+00> : vector<7x16xf32>
    %112 = tpu.matmul %21, %106, %cst_85 {dimension_numbers = #tpu.dot_dimension_numbers<[1], [0], [0], [1], [0, 0, 1, 1], [], []>} : vector<7x16xf32>, vector<16x16xf32>, vector<7x16xf32> -> vector<7x16xf32>
    %cst_86 = arith.constant dense<0.000000e+00> : vector<7x7xf32>
    %113 = tpu.matmul %112, %27, %cst_86 {dimension_numbers = #tpu.dot_dimension_numbers<[1], [0], [0], [1], [0, 0, 1, 1], [], []>} : vector<7x16xf32>, vector<16x7xf32>, vector<7x7xf32> -> vector<7x7xf32>
    %114 = arith.addf %111, %113 : vector<7x7xf32>
    %c0_87 = arith.constant 0 : index
    %c0_88 = arith.constant 0 : index
    %c0_89 = arith.constant 0 : index
    %115 = vector.load %arg5[%c0_87, %c0_88, %c0_89] : memref<1x7x7xf32, #tpu.memory_space<vmem>>, vector<1x7x7xf32>
    %116 = vector.shape_cast %115 : vector<1x7x7xf32> to vector<7x7xf32>
    %117 = vector.shape_cast %114 : vector<7x7xf32> to vector<1x7x7xf32>
    tpu.vector_store %arg5[%c0_87, %c0_88, %c0_89], %117 {strides = array<i32>} : memref<1x7x7xf32, #tpu.memory_space<vmem>>, vector<1x7x7xf32>,
    return
  }
  func.func @transform_0(%arg0: i32) -> i32 {
    %c0_i32 = arith.constant 0 : i32
    %c0_i32_0 = arith.constant 0 : i32
    return %c0_i32 : i32
  }
  func.func @transform_1(%arg0: i32) -> (i32, i32, i32, i32) {
    %c0_i32 = arith.constant 0 : i32
    %c0_i32_0 = arith.constant 0 : i32
    %c0_i32_1 = arith.constant 0 : i32
    %c0_i32_2 = arith.constant 0 : i32
    return %arg0, %c0_i32, %c0_i32_0, %c0_i32_1 : i32, i32, i32, i32
  }
  func.func @transform_2(%arg0: i32) -> (i32, i32, i32) {
    %c0_i32 = arith.constant 0 : i32
    %c0_i32_0 = arith.constant 0 : i32
    %c0_i32_1 = arith.constant 0 : i32
    %c0_i32_2 = arith.constant 0 : i32
    return %c0_i32, %c0_i32_0, %c0_i32_1 : i32, i32, i32
  }
  func.func @transform_3(%arg0: i32) -> (i32, i32, i32) {
    %c0_i32 = arith.constant 0 : i32
    %c0_i32_0 = arith.constant 0 : i32
    %c0_i32_1 = arith.constant 0 : i32
    %c0_i32_2 = arith.constant 0 : i32
    return %c0_i32, %c0_i32_0, %c0_i32_1 : i32, i32, i32
  }
  func.func @transform_4(%arg0: i32) -> (i32, i32, i32) {
    %c0_i32 = arith.constant 0 : i32
    %c0_i32_0 = arith.constant 0 : i32
    %c0_i32_1 = arith.constant 0 : i32
    return %arg0, %c0_i32, %c0_i32_0 : i32, i32, i32
  }
}

module attributes {stable_mosaic.version = 11 : i64} {
  func.func @_restriction_general_kernel(%arg0: i32, %arg1: memref<144xf32, #tpu.memory_space<smem>>, %arg2: memref<1x64x8x8xf32, #tpu.memory_space<vmem>>, %arg3: memref<1x7x7xf32, #tpu.memory_space<vmem>>) attributes {dimension_semantics = [#tpu.dimension_semantics<parallel>], iteration_bounds = array<i64: 2>, scalar_prefetch = 0 : i64, scratch_operands = 0 : i64, tpu.core_type = #tpu.core_type<tc>, window_params = [{transform_indices = @transform_0, window_bounds = array<i64: 144>}, {transform_indices = @transform_1, window_bounds = array<i64: 1, 64, 8, 8>}, {transform_indices = @transform_2, window_bounds = array<i64: 1, 7, 7>}]} {
    %c0 = arith.constant 0 : index
    %c0_0 = arith.constant 0 : index
    %c0_1 = arith.constant 0 : index
    %c0_2 = arith.constant 0 : index
    %0 = vector.load %arg2[%c0, %c0_0, %c0_1, %c0_2] : memref<1x64x8x8xf32, #tpu.memory_space<vmem>>, vector<1x1x8x8xf32>
    %1 = vector.shape_cast %0 : vector<1x1x8x8xf32> to vector<1x8x8xf32>
    %c0_3 = arith.constant 0 : index
    %2 = memref.load %arg1[%c0_3] : memref<144xf32, #tpu.memory_space<smem>>
    %3 = vector.broadcast %2 : f32 to vector<1x8x8xf32>
    %4 = arith.mulf %1, %3 : vector<1x8x8xf32>
    %c32 = arith.constant 32 : index
    %5 = memref.load %arg1[%c32] : memref<144xf32, #tpu.memory_space<smem>>
    %6 = vector.broadcast %5 : f32 to vector<1x8x8xf32>
    %7 = arith.mulf %1, %6 : vector<1x8x8xf32>
    %c96 = arith.constant 96 : index
    %8 = memref.load %arg1[%c96] : memref<144xf32, #tpu.memory_space<smem>>
    %9 = vector.broadcast %8 : f32 to vector<1x8x8xf32>
    %10 = arith.mulf %1, %9 : vector<1x8x8xf32>
    %c128 = arith.constant 128 : index
    %11 = memref.load %arg1[%c128] : memref<144xf32, #tpu.memory_space<smem>>
    %12 = vector.broadcast %11 : f32 to vector<1x8x8xf32>
    %13 = arith.mulf %1, %12 : vector<1x8x8xf32>
    %c0_4 = arith.constant 0 : index
    %c1 = arith.constant 1 : index
    %c0_5 = arith.constant 0 : index
    %c0_6 = arith.constant 0 : index
    %14 = vector.load %arg2[%c0_4, %c1, %c0_5, %c0_6] : memref<1x64x8x8xf32, #tpu.memory_space<vmem>>, vector<1x1x8x8xf32>
    %15 = vector.shape_cast %14 : vector<1x1x8x8xf32> to vector<1x8x8xf32>
    %c1_7 = arith.constant 1 : index
    %16 = memref.load %arg1[%c1_7] : memref<144xf32, #tpu.memory_space<smem>>
    %17 = vector.broadcast %16 : f32 to vector<1x8x8xf32>
    %18 = arith.mulf %15, %17 : vector<1x8x8xf32>
    %19 = arith.addf %4, %18 : vector<1x8x8xf32>
    %c33 = arith.constant 33 : index
    %20 = memref.load %arg1[%c33] : memref<144xf32, #tpu.memory_space<smem>>
    %21 = vector.broadcast %20 : f32 to vector<1x8x8xf32>
    %22 = arith.mulf %15, %21 : vector<1x8x8xf32>
    %23 = arith.addf %7, %22 : vector<1x8x8xf32>
    %c97 = arith.constant 97 : index
    %24 = memref.load %arg1[%c97] : memref<144xf32, #tpu.memory_space<smem>>
    %25 = vector.broadcast %24 : f32 to vector<1x8x8xf32>
    %26 = arith.mulf %15, %25 : vector<1x8x8xf32>
    %27 = arith.addf %10, %26 : vector<1x8x8xf32>
    %c129 = arith.constant 129 : index
    %28 = memref.load %arg1[%c129] : memref<144xf32, #tpu.memory_space<smem>>
    %29 = vector.broadcast %28 : f32 to vector<1x8x8xf32>
    %30 = arith.mulf %15, %29 : vector<1x8x8xf32>
    %31 = arith.addf %13, %30 : vector<1x8x8xf32>
    %c0_8 = arith.constant 0 : index
    %c2 = arith.constant 2 : index
    %c0_9 = arith.constant 0 : index
    %c0_10 = arith.constant 0 : index
    %32 = vector.load %arg2[%c0_8, %c2, %c0_9, %c0_10] : memref<1x64x8x8xf32, #tpu.memory_space<vmem>>, vector<1x1x8x8xf32>
    %33 = vector.shape_cast %32 : vector<1x1x8x8xf32> to vector<1x8x8xf32>
    %c2_11 = arith.constant 2 : index
    %34 = memref.load %arg1[%c2_11] : memref<144xf32, #tpu.memory_space<smem>>
    %35 = vector.broadcast %34 : f32 to vector<1x8x8xf32>
    %36 = arith.mulf %33, %35 : vector<1x8x8xf32>
    %37 = arith.addf %19, %36 : vector<1x8x8xf32>
    %c34 = arith.constant 34 : index
    %38 = memref.load %arg1[%c34] : memref<144xf32, #tpu.memory_space<smem>>
    %39 = vector.broadcast %38 : f32 to vector<1x8x8xf32>
    %40 = arith.mulf %33, %39 : vector<1x8x8xf32>
    %41 = arith.addf %23, %40 : vector<1x8x8xf32>
    %c98 = arith.constant 98 : index
    %42 = memref.load %arg1[%c98] : memref<144xf32, #tpu.memory_space<smem>>
    %43 = vector.broadcast %42 : f32 to vector<1x8x8xf32>
    %44 = arith.mulf %33, %43 : vector<1x8x8xf32>
    %45 = arith.addf %27, %44 : vector<1x8x8xf32>
    %c130 = arith.constant 130 : index
    %46 = memref.load %arg1[%c130] : memref<144xf32, #tpu.memory_space<smem>>
    %47 = vector.broadcast %46 : f32 to vector<1x8x8xf32>
    %48 = arith.mulf %33, %47 : vector<1x8x8xf32>
    %49 = arith.addf %31, %48 : vector<1x8x8xf32>
    %c0_12 = arith.constant 0 : index
    %c3 = arith.constant 3 : index
    %c0_13 = arith.constant 0 : index
    %c0_14 = arith.constant 0 : index
    %50 = vector.load %arg2[%c0_12, %c3, %c0_13, %c0_14] : memref<1x64x8x8xf32, #tpu.memory_space<vmem>>, vector<1x1x8x8xf32>
    %51 = vector.shape_cast %50 : vector<1x1x8x8xf32> to vector<1x8x8xf32>
    %c3_15 = arith.constant 3 : index
    %52 = memref.load %arg1[%c3_15] : memref<144xf32, #tpu.memory_space<smem>>
    %53 = vector.broadcast %52 : f32 to vector<1x8x8xf32>
    %54 = arith.mulf %51, %53 : vector<1x8x8xf32>
    %55 = arith.addf %37, %54 : vector<1x8x8xf32>
    %c35 = arith.constant 35 : index
    %56 = memref.load %arg1[%c35] : memref<144xf32, #tpu.memory_space<smem>>
    %57 = vector.broadcast %56 : f32 to vector<1x8x8xf32>
    %58 = arith.mulf %51, %57 : vector<1x8x8xf32>
    %59 = arith.addf %41, %58 : vector<1x8x8xf32>
    %c99 = arith.constant 99 : index
    %60 = memref.load %arg1[%c99] : memref<144xf32, #tpu.memory_space<smem>>
    %61 = vector.broadcast %60 : f32 to vector<1x8x8xf32>
    %62 = arith.mulf %51, %61 : vector<1x8x8xf32>
    %63 = arith.addf %45, %62 : vector<1x8x8xf32>
    %c131 = arith.constant 131 : index
    %64 = memref.load %arg1[%c131] : memref<144xf32, #tpu.memory_space<smem>>
    %65 = vector.broadcast %64 : f32 to vector<1x8x8xf32>
    %66 = arith.mulf %51, %65 : vector<1x8x8xf32>
    %67 = arith.addf %49, %66 : vector<1x8x8xf32>
    %c0_16 = arith.constant 0 : index
    %c4 = arith.constant 4 : index
    %c0_17 = arith.constant 0 : index
    %c0_18 = arith.constant 0 : index
    %68 = vector.load %arg2[%c0_16, %c4, %c0_17, %c0_18] : memref<1x64x8x8xf32, #tpu.memory_space<vmem>>, vector<1x1x8x8xf32>
    %69 = vector.shape_cast %68 : vector<1x1x8x8xf32> to vector<1x8x8xf32>
    %c4_19 = arith.constant 4 : index
    %70 = memref.load %arg1[%c4_19] : memref<144xf32, #tpu.memory_space<smem>>
    %71 = vector.broadcast %70 : f32 to vector<1x8x8xf32>
    %72 = arith.mulf %69, %71 : vector<1x8x8xf32>
    %73 = arith.addf %55, %72 : vector<1x8x8xf32>
    %c36 = arith.constant 36 : index
    %74 = memref.load %arg1[%c36] : memref<144xf32, #tpu.memory_space<smem>>
    %75 = vector.broadcast %74 : f32 to vector<1x8x8xf32>
    %76 = arith.mulf %69, %75 : vector<1x8x8xf32>
    %77 = arith.addf %59, %76 : vector<1x8x8xf32>
    %c100 = arith.constant 100 : index
    %78 = memref.load %arg1[%c100] : memref<144xf32, #tpu.memory_space<smem>>
    %79 = vector.broadcast %78 : f32 to vector<1x8x8xf32>
    %80 = arith.mulf %69, %79 : vector<1x8x8xf32>
    %81 = arith.addf %63, %80 : vector<1x8x8xf32>
    %c132 = arith.constant 132 : index
    %82 = memref.load %arg1[%c132] : memref<144xf32, #tpu.memory_space<smem>>
    %83 = vector.broadcast %82 : f32 to vector<1x8x8xf32>
    %84 = arith.mulf %69, %83 : vector<1x8x8xf32>
    %85 = arith.addf %67, %84 : vector<1x8x8xf32>
    %c0_20 = arith.constant 0 : index
    %c5 = arith.constant 5 : index
    %c0_21 = arith.constant 0 : index
    %c0_22 = arith.constant 0 : index
    %86 = vector.load %arg2[%c0_20, %c5, %c0_21, %c0_22] : memref<1x64x8x8xf32, #tpu.memory_space<vmem>>, vector<1x1x8x8xf32>
    %87 = vector.shape_cast %86 : vector<1x1x8x8xf32> to vector<1x8x8xf32>
    %c5_23 = arith.constant 5 : index
    %88 = memref.load %arg1[%c5_23] : memref<144xf32, #tpu.memory_space<smem>>
    %89 = vector.broadcast %88 : f32 to vector<1x8x8xf32>
    %90 = arith.mulf %87, %89 : vector<1x8x8xf32>
    %91 = arith.addf %73, %90 : vector<1x8x8xf32>
    %c37 = arith.constant 37 : index
    %92 = memref.load %arg1[%c37] : memref<144xf32, #tpu.memory_space<smem>>
    %93 = vector.broadcast %92 : f32 to vector<1x8x8xf32>
    %94 = arith.mulf %87, %93 : vector<1x8x8xf32>
    %95 = arith.addf %77, %94 : vector<1x8x8xf32>
    %c101 = arith.constant 101 : index
    %96 = memref.load %arg1[%c101] : memref<144xf32, #tpu.memory_space<smem>>
    %97 = vector.broadcast %96 : f32 to vector<1x8x8xf32>
    %98 = arith.mulf %87, %97 : vector<1x8x8xf32>
    %99 = arith.addf %81, %98 : vector<1x8x8xf32>
    %c133 = arith.constant 133 : index
    %100 = memref.load %arg1[%c133] : memref<144xf32, #tpu.memory_space<smem>>
    %101 = vector.broadcast %100 : f32 to vector<1x8x8xf32>
    %102 = arith.mulf %87, %101 : vector<1x8x8xf32>
    %103 = arith.addf %85, %102 : vector<1x8x8xf32>
    %c0_24 = arith.constant 0 : index
    %c6 = arith.constant 6 : index
    %c0_25 = arith.constant 0 : index
    %c0_26 = arith.constant 0 : index
    %104 = vector.load %arg2[%c0_24, %c6, %c0_25, %c0_26] : memref<1x64x8x8xf32, #tpu.memory_space<vmem>>, vector<1x1x8x8xf32>
    %105 = vector.shape_cast %104 : vector<1x1x8x8xf32> to vector<1x8x8xf32>
    %c6_27 = arith.constant 6 : index
    %106 = memref.load %arg1[%c6_27] : memref<144xf32, #tpu.memory_space<smem>>
    %107 = vector.broadcast %106 : f32 to vector<1x8x8xf32>
    %108 = arith.mulf %105, %107 : vector<1x8x8xf32>
    %109 = arith.addf %91, %108 : vector<1x8x8xf32>
    %c38 = arith.constant 38 : index
    %110 = memref.load %arg1[%c38] : memref<144xf32, #tpu.memory_space<smem>>
    %111 = vector.broadcast %110 : f32 to vector<1x8x8xf32>
    %112 = arith.mulf %105, %111 : vector<1x8x8xf32>
    %113 = arith.addf %95, %112 : vector<1x8x8xf32>
    %c102 = arith.constant 102 : index
    %114 = memref.load %arg1[%c102] : memref<144xf32, #tpu.memory_space<smem>>
    %115 = vector.broadcast %114 : f32 to vector<1x8x8xf32>
    %116 = arith.mulf %105, %115 : vector<1x8x8xf32>
    %117 = arith.addf %99, %116 : vector<1x8x8xf32>
    %c134 = arith.constant 134 : index
    %118 = memref.load %arg1[%c134] : memref<144xf32, #tpu.memory_space<smem>>
    %119 = vector.broadcast %118 : f32 to vector<1x8x8xf32>
    %120 = arith.mulf %105, %119 : vector<1x8x8xf32>
    %121 = arith.addf %103, %120 : vector<1x8x8xf32>
    %c0_28 = arith.constant 0 : index
    %c7 = arith.constant 7 : index
    %c0_29 = arith.constant 0 : index
    %c0_30 = arith.constant 0 : index
    %122 = vector.load %arg2[%c0_28, %c7, %c0_29, %c0_30] : memref<1x64x8x8xf32, #tpu.memory_space<vmem>>, vector<1x1x8x8xf32>
    %123 = vector.shape_cast %122 : vector<1x1x8x8xf32> to vector<1x8x8xf32>
    %c7_31 = arith.constant 7 : index
    %124 = memref.load %arg1[%c7_31] : memref<144xf32, #tpu.memory_space<smem>>
    %125 = vector.broadcast %124 : f32 to vector<1x8x8xf32>
    %126 = arith.mulf %123, %125 : vector<1x8x8xf32>
    %127 = arith.addf %109, %126 : vector<1x8x8xf32>
    %c39 = arith.constant 39 : index
    %128 = memref.load %arg1[%c39] : memref<144xf32, #tpu.memory_space<smem>>
    %129 = vector.broadcast %128 : f32 to vector<1x8x8xf32>
    %130 = arith.mulf %123, %129 : vector<1x8x8xf32>
    %131 = arith.addf %113, %130 : vector<1x8x8xf32>
    %c103 = arith.constant 103 : index
    %132 = memref.load %arg1[%c103] : memref<144xf32, #tpu.memory_space<smem>>
    %133 = vector.broadcast %132 : f32 to vector<1x8x8xf32>
    %134 = arith.mulf %123, %133 : vector<1x8x8xf32>
    %135 = arith.addf %117, %134 : vector<1x8x8xf32>
    %c135 = arith.constant 135 : index
    %136 = memref.load %arg1[%c135] : memref<144xf32, #tpu.memory_space<smem>>
    %137 = vector.broadcast %136 : f32 to vector<1x8x8xf32>
    %138 = arith.mulf %123, %137 : vector<1x8x8xf32>
    %139 = arith.addf %121, %138 : vector<1x8x8xf32>
    %c0_32 = arith.constant 0 : index
    %c8 = arith.constant 8 : index
    %c0_33 = arith.constant 0 : index
    %c0_34 = arith.constant 0 : index
    %140 = vector.load %arg2[%c0_32, %c8, %c0_33, %c0_34] : memref<1x64x8x8xf32, #tpu.memory_space<vmem>>, vector<1x1x8x8xf32>
    %141 = vector.shape_cast %140 : vector<1x1x8x8xf32> to vector<1x8x8xf32>
    %c8_35 = arith.constant 8 : index
    %142 = memref.load %arg1[%c8_35] : memref<144xf32, #tpu.memory_space<smem>>
    %143 = vector.broadcast %142 : f32 to vector<1x8x8xf32>
    %144 = arith.mulf %141, %143 : vector<1x8x8xf32>
    %145 = arith.addf %127, %144 : vector<1x8x8xf32>
    %c40 = arith.constant 40 : index
    %146 = memref.load %arg1[%c40] : memref<144xf32, #tpu.memory_space<smem>>
    %147 = vector.broadcast %146 : f32 to vector<1x8x8xf32>
    %148 = arith.mulf %141, %147 : vector<1x8x8xf32>
    %149 = arith.addf %131, %148 : vector<1x8x8xf32>
    %c104 = arith.constant 104 : index
    %150 = memref.load %arg1[%c104] : memref<144xf32, #tpu.memory_space<smem>>
    %151 = vector.broadcast %150 : f32 to vector<1x8x8xf32>
    %152 = arith.mulf %141, %151 : vector<1x8x8xf32>
    %153 = arith.addf %135, %152 : vector<1x8x8xf32>
    %c136 = arith.constant 136 : index
    %154 = memref.load %arg1[%c136] : memref<144xf32, #tpu.memory_space<smem>>
    %155 = vector.broadcast %154 : f32 to vector<1x8x8xf32>
    %156 = arith.mulf %141, %155 : vector<1x8x8xf32>
    %157 = arith.addf %139, %156 : vector<1x8x8xf32>
    %c0_36 = arith.constant 0 : index
    %c9 = arith.constant 9 : index
    %c0_37 = arith.constant 0 : index
    %c0_38 = arith.constant 0 : index
    %158 = vector.load %arg2[%c0_36, %c9, %c0_37, %c0_38] : memref<1x64x8x8xf32, #tpu.memory_space<vmem>>, vector<1x1x8x8xf32>
    %159 = vector.shape_cast %158 : vector<1x1x8x8xf32> to vector<1x8x8xf32>
    %c9_39 = arith.constant 9 : index
    %160 = memref.load %arg1[%c9_39] : memref<144xf32, #tpu.memory_space<smem>>
    %161 = vector.broadcast %160 : f32 to vector<1x8x8xf32>
    %162 = arith.mulf %159, %161 : vector<1x8x8xf32>
    %163 = arith.addf %145, %162 : vector<1x8x8xf32>
    %c41 = arith.constant 41 : index
    %164 = memref.load %arg1[%c41] : memref<144xf32, #tpu.memory_space<smem>>
    %165 = vector.broadcast %164 : f32 to vector<1x8x8xf32>
    %166 = arith.mulf %159, %165 : vector<1x8x8xf32>
    %167 = arith.addf %149, %166 : vector<1x8x8xf32>
    %c105 = arith.constant 105 : index
    %168 = memref.load %arg1[%c105] : memref<144xf32, #tpu.memory_space<smem>>
    %169 = vector.broadcast %168 : f32 to vector<1x8x8xf32>
    %170 = arith.mulf %159, %169 : vector<1x8x8xf32>
    %171 = arith.addf %153, %170 : vector<1x8x8xf32>
    %c137 = arith.constant 137 : index
    %172 = memref.load %arg1[%c137] : memref<144xf32, #tpu.memory_space<smem>>
    %173 = vector.broadcast %172 : f32 to vector<1x8x8xf32>
    %174 = arith.mulf %159, %173 : vector<1x8x8xf32>
    %175 = arith.addf %157, %174 : vector<1x8x8xf32>
    %c0_40 = arith.constant 0 : index
    %c10 = arith.constant 10 : index
    %c0_41 = arith.constant 0 : index
    %c0_42 = arith.constant 0 : index
    %176 = vector.load %arg2[%c0_40, %c10, %c0_41, %c0_42] : memref<1x64x8x8xf32, #tpu.memory_space<vmem>>, vector<1x1x8x8xf32>
    %177 = vector.shape_cast %176 : vector<1x1x8x8xf32> to vector<1x8x8xf32>
    %c10_43 = arith.constant 10 : index
    %178 = memref.load %arg1[%c10_43] : memref<144xf32, #tpu.memory_space<smem>>
    %179 = vector.broadcast %178 : f32 to vector<1x8x8xf32>
    %180 = arith.mulf %177, %179 : vector<1x8x8xf32>
    %181 = arith.addf %163, %180 : vector<1x8x8xf32>
    %c42 = arith.constant 42 : index
    %182 = memref.load %arg1[%c42] : memref<144xf32, #tpu.memory_space<smem>>
    %183 = vector.broadcast %182 : f32 to vector<1x8x8xf32>
    %184 = arith.mulf %177, %183 : vector<1x8x8xf32>
    %185 = arith.addf %167, %184 : vector<1x8x8xf32>
    %c106 = arith.constant 106 : index
    %186 = memref.load %arg1[%c106] : memref<144xf32, #tpu.memory_space<smem>>
    %187 = vector.broadcast %186 : f32 to vector<1x8x8xf32>
    %188 = arith.mulf %177, %187 : vector<1x8x8xf32>
    %189 = arith.addf %171, %188 : vector<1x8x8xf32>
    %c138 = arith.constant 138 : index
    %190 = memref.load %arg1[%c138] : memref<144xf32, #tpu.memory_space<smem>>
    %191 = vector.broadcast %190 : f32 to vector<1x8x8xf32>
    %192 = arith.mulf %177, %191 : vector<1x8x8xf32>
    %193 = arith.addf %175, %192 : vector<1x8x8xf32>
    %c0_44 = arith.constant 0 : index
    %c11 = arith.constant 11 : index
    %c0_45 = arith.constant 0 : index
    %c0_46 = arith.constant 0 : index
    %194 = vector.load %arg2[%c0_44, %c11, %c0_45, %c0_46] : memref<1x64x8x8xf32, #tpu.memory_space<vmem>>, vector<1x1x8x8xf32>
    %195 = vector.shape_cast %194 : vector<1x1x8x8xf32> to vector<1x8x8xf32>
    %c11_47 = arith.constant 11 : index
    %196 = memref.load %arg1[%c11_47] : memref<144xf32, #tpu.memory_space<smem>>
    %197 = vector.broadcast %196 : f32 to vector<1x8x8xf32>
    %198 = arith.mulf %195, %197 : vector<1x8x8xf32>
    %199 = arith.addf %181, %198 : vector<1x8x8xf32>
    %c43 = arith.constant 43 : index
    %200 = memref.load %arg1[%c43] : memref<144xf32, #tpu.memory_space<smem>>
    %201 = vector.broadcast %200 : f32 to vector<1x8x8xf32>
    %202 = arith.mulf %195, %201 : vector<1x8x8xf32>
    %203 = arith.addf %185, %202 : vector<1x8x8xf32>
    %c107 = arith.constant 107 : index
    %204 = memref.load %arg1[%c107] : memref<144xf32, #tpu.memory_space<smem>>
    %205 = vector.broadcast %204 : f32 to vector<1x8x8xf32>
    %206 = arith.mulf %195, %205 : vector<1x8x8xf32>
    %207 = arith.addf %189, %206 : vector<1x8x8xf32>
    %c139 = arith.constant 139 : index
    %208 = memref.load %arg1[%c139] : memref<144xf32, #tpu.memory_space<smem>>
    %209 = vector.broadcast %208 : f32 to vector<1x8x8xf32>
    %210 = arith.mulf %195, %209 : vector<1x8x8xf32>
    %211 = arith.addf %193, %210 : vector<1x8x8xf32>
    %c0_48 = arith.constant 0 : index
    %c12 = arith.constant 12 : index
    %c0_49 = arith.constant 0 : index
    %c0_50 = arith.constant 0 : index
    %212 = vector.load %arg2[%c0_48, %c12, %c0_49, %c0_50] : memref<1x64x8x8xf32, #tpu.memory_space<vmem>>, vector<1x1x8x8xf32>
    %213 = vector.shape_cast %212 : vector<1x1x8x8xf32> to vector<1x8x8xf32>
    %c12_51 = arith.constant 12 : index
    %214 = memref.load %arg1[%c12_51] : memref<144xf32, #tpu.memory_space<smem>>
    %215 = vector.broadcast %214 : f32 to vector<1x8x8xf32>
    %216 = arith.mulf %213, %215 : vector<1x8x8xf32>
    %217 = arith.addf %199, %216 : vector<1x8x8xf32>
    %c44 = arith.constant 44 : index
    %218 = memref.load %arg1[%c44] : memref<144xf32, #tpu.memory_space<smem>>
    %219 = vector.broadcast %218 : f32 to vector<1x8x8xf32>
    %220 = arith.mulf %213, %219 : vector<1x8x8xf32>
    %221 = arith.addf %203, %220 : vector<1x8x8xf32>
    %c108 = arith.constant 108 : index
    %222 = memref.load %arg1[%c108] : memref<144xf32, #tpu.memory_space<smem>>
    %223 = vector.broadcast %222 : f32 to vector<1x8x8xf32>
    %224 = arith.mulf %213, %223 : vector<1x8x8xf32>
    %225 = arith.addf %207, %224 : vector<1x8x8xf32>
    %c140 = arith.constant 140 : index
    %226 = memref.load %arg1[%c140] : memref<144xf32, #tpu.memory_space<smem>>
    %227 = vector.broadcast %226 : f32 to vector<1x8x8xf32>
    %228 = arith.mulf %213, %227 : vector<1x8x8xf32>
    %229 = arith.addf %211, %228 : vector<1x8x8xf32>
    %c0_52 = arith.constant 0 : index
    %c13 = arith.constant 13 : index
    %c0_53 = arith.constant 0 : index
    %c0_54 = arith.constant 0 : index
    %230 = vector.load %arg2[%c0_52, %c13, %c0_53, %c0_54] : memref<1x64x8x8xf32, #tpu.memory_space<vmem>>, vector<1x1x8x8xf32>
    %231 = vector.shape_cast %230 : vector<1x1x8x8xf32> to vector<1x8x8xf32>
    %c13_55 = arith.constant 13 : index
    %232 = memref.load %arg1[%c13_55] : memref<144xf32, #tpu.memory_space<smem>>
    %233 = vector.broadcast %232 : f32 to vector<1x8x8xf32>
    %234 = arith.mulf %231, %233 : vector<1x8x8xf32>
    %235 = arith.addf %217, %234 : vector<1x8x8xf32>
    %c45 = arith.constant 45 : index
    %236 = memref.load %arg1[%c45] : memref<144xf32, #tpu.memory_space<smem>>
    %237 = vector.broadcast %236 : f32 to vector<1x8x8xf32>
    %238 = arith.mulf %231, %237 : vector<1x8x8xf32>
    %239 = arith.addf %221, %238 : vector<1x8x8xf32>
    %c109 = arith.constant 109 : index
    %240 = memref.load %arg1[%c109] : memref<144xf32, #tpu.memory_space<smem>>
    %241 = vector.broadcast %240 : f32 to vector<1x8x8xf32>
    %242 = arith.mulf %231, %241 : vector<1x8x8xf32>
    %243 = arith.addf %225, %242 : vector<1x8x8xf32>
    %c141 = arith.constant 141 : index
    %244 = memref.load %arg1[%c141] : memref<144xf32, #tpu.memory_space<smem>>
    %245 = vector.broadcast %244 : f32 to vector<1x8x8xf32>
    %246 = arith.mulf %231, %245 : vector<1x8x8xf32>
    %247 = arith.addf %229, %246 : vector<1x8x8xf32>
    %c0_56 = arith.constant 0 : index
    %c14 = arith.constant 14 : index
    %c0_57 = arith.constant 0 : index
    %c0_58 = arith.constant 0 : index
    %248 = vector.load %arg2[%c0_56, %c14, %c0_57, %c0_58] : memref<1x64x8x8xf32, #tpu.memory_space<vmem>>, vector<1x1x8x8xf32>
    %249 = vector.shape_cast %248 : vector<1x1x8x8xf32> to vector<1x8x8xf32>
    %c14_59 = arith.constant 14 : index
    %250 = memref.load %arg1[%c14_59] : memref<144xf32, #tpu.memory_space<smem>>
    %251 = vector.broadcast %250 : f32 to vector<1x8x8xf32>
    %252 = arith.mulf %249, %251 : vector<1x8x8xf32>
    %253 = arith.addf %235, %252 : vector<1x8x8xf32>
    %c46 = arith.constant 46 : index
    %254 = memref.load %arg1[%c46] : memref<144xf32, #tpu.memory_space<smem>>
    %255 = vector.broadcast %254 : f32 to vector<1x8x8xf32>
    %256 = arith.mulf %249, %255 : vector<1x8x8xf32>
    %257 = arith.addf %239, %256 : vector<1x8x8xf32>
    %c110 = arith.constant 110 : index
    %258 = memref.load %arg1[%c110] : memref<144xf32, #tpu.memory_space<smem>>
    %259 = vector.broadcast %258 : f32 to vector<1x8x8xf32>
    %260 = arith.mulf %249, %259 : vector<1x8x8xf32>
    %261 = arith.addf %243, %260 : vector<1x8x8xf32>
    %c142 = arith.constant 142 : index
    %262 = memref.load %arg1[%c142] : memref<144xf32, #tpu.memory_space<smem>>
    %263 = vector.broadcast %262 : f32 to vector<1x8x8xf32>
    %264 = arith.mulf %249, %263 : vector<1x8x8xf32>
    %265 = arith.addf %247, %264 : vector<1x8x8xf32>
    %c0_60 = arith.constant 0 : index
    %c15 = arith.constant 15 : index
    %c0_61 = arith.constant 0 : index
    %c0_62 = arith.constant 0 : index
    %266 = vector.load %arg2[%c0_60, %c15, %c0_61, %c0_62] : memref<1x64x8x8xf32, #tpu.memory_space<vmem>>, vector<1x1x8x8xf32>
    %267 = vector.shape_cast %266 : vector<1x1x8x8xf32> to vector<1x8x8xf32>
    %c15_63 = arith.constant 15 : index
    %268 = memref.load %arg1[%c15_63] : memref<144xf32, #tpu.memory_space<smem>>
    %269 = vector.broadcast %268 : f32 to vector<1x8x8xf32>
    %270 = arith.mulf %267, %269 : vector<1x8x8xf32>
    %271 = arith.addf %253, %270 : vector<1x8x8xf32>
    %c47 = arith.constant 47 : index
    %272 = memref.load %arg1[%c47] : memref<144xf32, #tpu.memory_space<smem>>
    %273 = vector.broadcast %272 : f32 to vector<1x8x8xf32>
    %274 = arith.mulf %267, %273 : vector<1x8x8xf32>
    %275 = arith.addf %257, %274 : vector<1x8x8xf32>
    %c111 = arith.constant 111 : index
    %276 = memref.load %arg1[%c111] : memref<144xf32, #tpu.memory_space<smem>>
    %277 = vector.broadcast %276 : f32 to vector<1x8x8xf32>
    %278 = arith.mulf %267, %277 : vector<1x8x8xf32>
    %279 = arith.addf %261, %278 : vector<1x8x8xf32>
    %c143 = arith.constant 143 : index
    %280 = memref.load %arg1[%c143] : memref<144xf32, #tpu.memory_space<smem>>
    %281 = vector.broadcast %280 : f32 to vector<1x8x8xf32>
    %282 = arith.mulf %267, %281 : vector<1x8x8xf32>
    %283 = arith.addf %265, %282 : vector<1x8x8xf32>
    %284 = vector.extract_strided_slice %271 {offsets = [0, 0, 0], sizes = [1, 7, 7], strides = [1, 1, 1]} : vector<1x8x8xf32> to vector<1x7x7xf32>
    %285 = vector.extract_strided_slice %275 {offsets = [0, 0, 1], sizes = [1, 7, 7], strides = [1, 1, 1]} : vector<1x8x8xf32> to vector<1x7x7xf32>
    %286 = arith.addf %284, %285 : vector<1x7x7xf32>
    %287 = vector.extract_strided_slice %279 {offsets = [0, 1, 0], sizes = [1, 7, 7], strides = [1, 1, 1]} : vector<1x8x8xf32> to vector<1x7x7xf32>
    %288 = arith.addf %286, %287 : vector<1x7x7xf32>
    %289 = vector.extract_strided_slice %283 {offsets = [0, 1, 1], sizes = [1, 7, 7], strides = [1, 1, 1]} : vector<1x8x8xf32> to vector<1x7x7xf32>
    %290 = arith.addf %288, %289 : vector<1x7x7xf32>
    %c0_64 = arith.constant 0 : index
    %c16 = arith.constant 16 : index
    %c0_65 = arith.constant 0 : index
    %c0_66 = arith.constant 0 : index
    %291 = vector.load %arg2[%c0_64, %c16, %c0_65, %c0_66] : memref<1x64x8x8xf32, #tpu.memory_space<vmem>>, vector<1x1x8x8xf32>
    %292 = vector.shape_cast %291 : vector<1x1x8x8xf32> to vector<1x8x8xf32>
    %c16_67 = arith.constant 16 : index
    %293 = memref.load %arg1[%c16_67] : memref<144xf32, #tpu.memory_space<smem>>
    %294 = vector.broadcast %293 : f32 to vector<1x8x8xf32>
    %295 = arith.mulf %292, %294 : vector<1x8x8xf32>
    %c112 = arith.constant 112 : index
    %296 = memref.load %arg1[%c112] : memref<144xf32, #tpu.memory_space<smem>>
    %297 = vector.broadcast %296 : f32 to vector<1x8x8xf32>
    %298 = arith.mulf %292, %297 : vector<1x8x8xf32>
    %c0_68 = arith.constant 0 : index
    %c17 = arith.constant 17 : index
    %c0_69 = arith.constant 0 : index
    %c0_70 = arith.constant 0 : index
    %299 = vector.load %arg2[%c0_68, %c17, %c0_69, %c0_70] : memref<1x64x8x8xf32, #tpu.memory_space<vmem>>, vector<1x1x8x8xf32>
    %300 = vector.shape_cast %299 : vector<1x1x8x8xf32> to vector<1x8x8xf32>
    %c17_71 = arith.constant 17 : index
    %301 = memref.load %arg1[%c17_71] : memref<144xf32, #tpu.memory_space<smem>>
    %302 = vector.broadcast %301 : f32 to vector<1x8x8xf32>
    %303 = arith.mulf %300, %302 : vector<1x8x8xf32>
    %304 = arith.addf %295, %303 : vector<1x8x8xf32>
    %c113 = arith.constant 113 : index
    %305 = memref.load %arg1[%c113] : memref<144xf32, #tpu.memory_space<smem>>
    %306 = vector.broadcast %305 : f32 to vector<1x8x8xf32>
    %307 = arith.mulf %300, %306 : vector<1x8x8xf32>
    %308 = arith.addf %298, %307 : vector<1x8x8xf32>
    %c0_72 = arith.constant 0 : index
    %c18 = arith.constant 18 : index
    %c0_73 = arith.constant 0 : index
    %c0_74 = arith.constant 0 : index
    %309 = vector.load %arg2[%c0_72, %c18, %c0_73, %c0_74] : memref<1x64x8x8xf32, #tpu.memory_space<vmem>>, vector<1x1x8x8xf32>
    %310 = vector.shape_cast %309 : vector<1x1x8x8xf32> to vector<1x8x8xf32>
    %c18_75 = arith.constant 18 : index
    %311 = memref.load %arg1[%c18_75] : memref<144xf32, #tpu.memory_space<smem>>
    %312 = vector.broadcast %311 : f32 to vector<1x8x8xf32>
    %313 = arith.mulf %310, %312 : vector<1x8x8xf32>
    %314 = arith.addf %304, %313 : vector<1x8x8xf32>
    %c114 = arith.constant 114 : index
    %315 = memref.load %arg1[%c114] : memref<144xf32, #tpu.memory_space<smem>>
    %316 = vector.broadcast %315 : f32 to vector<1x8x8xf32>
    %317 = arith.mulf %310, %316 : vector<1x8x8xf32>
    %318 = arith.addf %308, %317 : vector<1x8x8xf32>
    %c0_76 = arith.constant 0 : index
    %c19 = arith.constant 19 : index
    %c0_77 = arith.constant 0 : index
    %c0_78 = arith.constant 0 : index
    %319 = vector.load %arg2[%c0_76, %c19, %c0_77, %c0_78] : memref<1x64x8x8xf32, #tpu.memory_space<vmem>>, vector<1x1x8x8xf32>
    %320 = vector.shape_cast %319 : vector<1x1x8x8xf32> to vector<1x8x8xf32>
    %c19_79 = arith.constant 19 : index
    %321 = memref.load %arg1[%c19_79] : memref<144xf32, #tpu.memory_space<smem>>
    %322 = vector.broadcast %321 : f32 to vector<1x8x8xf32>
    %323 = arith.mulf %320, %322 : vector<1x8x8xf32>
    %324 = arith.addf %314, %323 : vector<1x8x8xf32>
    %c115 = arith.constant 115 : index
    %325 = memref.load %arg1[%c115] : memref<144xf32, #tpu.memory_space<smem>>
    %326 = vector.broadcast %325 : f32 to vector<1x8x8xf32>
    %327 = arith.mulf %320, %326 : vector<1x8x8xf32>
    %328 = arith.addf %318, %327 : vector<1x8x8xf32>
    %c0_80 = arith.constant 0 : index
    %c20 = arith.constant 20 : index
    %c0_81 = arith.constant 0 : index
    %c0_82 = arith.constant 0 : index
    %329 = vector.load %arg2[%c0_80, %c20, %c0_81, %c0_82] : memref<1x64x8x8xf32, #tpu.memory_space<vmem>>, vector<1x1x8x8xf32>
    %330 = vector.shape_cast %329 : vector<1x1x8x8xf32> to vector<1x8x8xf32>
    %c20_83 = arith.constant 20 : index
    %331 = memref.load %arg1[%c20_83] : memref<144xf32, #tpu.memory_space<smem>>
    %332 = vector.broadcast %331 : f32 to vector<1x8x8xf32>
    %333 = arith.mulf %330, %332 : vector<1x8x8xf32>
    %334 = arith.addf %324, %333 : vector<1x8x8xf32>
    %c116 = arith.constant 116 : index
    %335 = memref.load %arg1[%c116] : memref<144xf32, #tpu.memory_space<smem>>
    %336 = vector.broadcast %335 : f32 to vector<1x8x8xf32>
    %337 = arith.mulf %330, %336 : vector<1x8x8xf32>
    %338 = arith.addf %328, %337 : vector<1x8x8xf32>
    %c0_84 = arith.constant 0 : index
    %c21 = arith.constant 21 : index
    %c0_85 = arith.constant 0 : index
    %c0_86 = arith.constant 0 : index
    %339 = vector.load %arg2[%c0_84, %c21, %c0_85, %c0_86] : memref<1x64x8x8xf32, #tpu.memory_space<vmem>>, vector<1x1x8x8xf32>
    %340 = vector.shape_cast %339 : vector<1x1x8x8xf32> to vector<1x8x8xf32>
    %c21_87 = arith.constant 21 : index
    %341 = memref.load %arg1[%c21_87] : memref<144xf32, #tpu.memory_space<smem>>
    %342 = vector.broadcast %341 : f32 to vector<1x8x8xf32>
    %343 = arith.mulf %340, %342 : vector<1x8x8xf32>
    %344 = arith.addf %334, %343 : vector<1x8x8xf32>
    %c117 = arith.constant 117 : index
    %345 = memref.load %arg1[%c117] : memref<144xf32, #tpu.memory_space<smem>>
    %346 = vector.broadcast %345 : f32 to vector<1x8x8xf32>
    %347 = arith.mulf %340, %346 : vector<1x8x8xf32>
    %348 = arith.addf %338, %347 : vector<1x8x8xf32>
    %c0_88 = arith.constant 0 : index
    %c22 = arith.constant 22 : index
    %c0_89 = arith.constant 0 : index
    %c0_90 = arith.constant 0 : index
    %349 = vector.load %arg2[%c0_88, %c22, %c0_89, %c0_90] : memref<1x64x8x8xf32, #tpu.memory_space<vmem>>, vector<1x1x8x8xf32>
    %350 = vector.shape_cast %349 : vector<1x1x8x8xf32> to vector<1x8x8xf32>
    %c22_91 = arith.constant 22 : index
    %351 = memref.load %arg1[%c22_91] : memref<144xf32, #tpu.memory_space<smem>>
    %352 = vector.broadcast %351 : f32 to vector<1x8x8xf32>
    %353 = arith.mulf %350, %352 : vector<1x8x8xf32>
    %354 = arith.addf %344, %353 : vector<1x8x8xf32>
    %c118 = arith.constant 118 : index
    %355 = memref.load %arg1[%c118] : memref<144xf32, #tpu.memory_space<smem>>
    %356 = vector.broadcast %355 : f32 to vector<1x8x8xf32>
    %357 = arith.mulf %350, %356 : vector<1x8x8xf32>
    %358 = arith.addf %348, %357 : vector<1x8x8xf32>
    %c0_92 = arith.constant 0 : index
    %c23 = arith.constant 23 : index
    %c0_93 = arith.constant 0 : index
    %c0_94 = arith.constant 0 : index
    %359 = vector.load %arg2[%c0_92, %c23, %c0_93, %c0_94] : memref<1x64x8x8xf32, #tpu.memory_space<vmem>>, vector<1x1x8x8xf32>
    %360 = vector.shape_cast %359 : vector<1x1x8x8xf32> to vector<1x8x8xf32>
    %c23_95 = arith.constant 23 : index
    %361 = memref.load %arg1[%c23_95] : memref<144xf32, #tpu.memory_space<smem>>
    %362 = vector.broadcast %361 : f32 to vector<1x8x8xf32>
    %363 = arith.mulf %360, %362 : vector<1x8x8xf32>
    %364 = arith.addf %354, %363 : vector<1x8x8xf32>
    %c119 = arith.constant 119 : index
    %365 = memref.load %arg1[%c119] : memref<144xf32, #tpu.memory_space<smem>>
    %366 = vector.broadcast %365 : f32 to vector<1x8x8xf32>
    %367 = arith.mulf %360, %366 : vector<1x8x8xf32>
    %368 = arith.addf %358, %367 : vector<1x8x8xf32>
    %c0_96 = arith.constant 0 : index
    %c24 = arith.constant 24 : index
    %c0_97 = arith.constant 0 : index
    %c0_98 = arith.constant 0 : index
    %369 = vector.load %arg2[%c0_96, %c24, %c0_97, %c0_98] : memref<1x64x8x8xf32, #tpu.memory_space<vmem>>, vector<1x1x8x8xf32>
    %370 = vector.shape_cast %369 : vector<1x1x8x8xf32> to vector<1x8x8xf32>
    %c24_99 = arith.constant 24 : index
    %371 = memref.load %arg1[%c24_99] : memref<144xf32, #tpu.memory_space<smem>>
    %372 = vector.broadcast %371 : f32 to vector<1x8x8xf32>
    %373 = arith.mulf %370, %372 : vector<1x8x8xf32>
    %374 = arith.addf %364, %373 : vector<1x8x8xf32>
    %c120 = arith.constant 120 : index
    %375 = memref.load %arg1[%c120] : memref<144xf32, #tpu.memory_space<smem>>
    %376 = vector.broadcast %375 : f32 to vector<1x8x8xf32>
    %377 = arith.mulf %370, %376 : vector<1x8x8xf32>
    %378 = arith.addf %368, %377 : vector<1x8x8xf32>
    %c0_100 = arith.constant 0 : index
    %c25 = arith.constant 25 : index
    %c0_101 = arith.constant 0 : index
    %c0_102 = arith.constant 0 : index
    %379 = vector.load %arg2[%c0_100, %c25, %c0_101, %c0_102] : memref<1x64x8x8xf32, #tpu.memory_space<vmem>>, vector<1x1x8x8xf32>
    %380 = vector.shape_cast %379 : vector<1x1x8x8xf32> to vector<1x8x8xf32>
    %c25_103 = arith.constant 25 : index
    %381 = memref.load %arg1[%c25_103] : memref<144xf32, #tpu.memory_space<smem>>
    %382 = vector.broadcast %381 : f32 to vector<1x8x8xf32>
    %383 = arith.mulf %380, %382 : vector<1x8x8xf32>
    %384 = arith.addf %374, %383 : vector<1x8x8xf32>
    %c121 = arith.constant 121 : index
    %385 = memref.load %arg1[%c121] : memref<144xf32, #tpu.memory_space<smem>>
    %386 = vector.broadcast %385 : f32 to vector<1x8x8xf32>
    %387 = arith.mulf %380, %386 : vector<1x8x8xf32>
    %388 = arith.addf %378, %387 : vector<1x8x8xf32>
    %c0_104 = arith.constant 0 : index
    %c26 = arith.constant 26 : index
    %c0_105 = arith.constant 0 : index
    %c0_106 = arith.constant 0 : index
    %389 = vector.load %arg2[%c0_104, %c26, %c0_105, %c0_106] : memref<1x64x8x8xf32, #tpu.memory_space<vmem>>, vector<1x1x8x8xf32>
    %390 = vector.shape_cast %389 : vector<1x1x8x8xf32> to vector<1x8x8xf32>
    %c26_107 = arith.constant 26 : index
    %391 = memref.load %arg1[%c26_107] : memref<144xf32, #tpu.memory_space<smem>>
    %392 = vector.broadcast %391 : f32 to vector<1x8x8xf32>
    %393 = arith.mulf %390, %392 : vector<1x8x8xf32>
    %394 = arith.addf %384, %393 : vector<1x8x8xf32>
    %c122 = arith.constant 122 : index
    %395 = memref.load %arg1[%c122] : memref<144xf32, #tpu.memory_space<smem>>
    %396 = vector.broadcast %395 : f32 to vector<1x8x8xf32>
    %397 = arith.mulf %390, %396 : vector<1x8x8xf32>
    %398 = arith.addf %388, %397 : vector<1x8x8xf32>
    %c0_108 = arith.constant 0 : index
    %c27 = arith.constant 27 : index
    %c0_109 = arith.constant 0 : index
    %c0_110 = arith.constant 0 : index
    %399 = vector.load %arg2[%c0_108, %c27, %c0_109, %c0_110] : memref<1x64x8x8xf32, #tpu.memory_space<vmem>>, vector<1x1x8x8xf32>
    %400 = vector.shape_cast %399 : vector<1x1x8x8xf32> to vector<1x8x8xf32>
    %c27_111 = arith.constant 27 : index
    %401 = memref.load %arg1[%c27_111] : memref<144xf32, #tpu.memory_space<smem>>
    %402 = vector.broadcast %401 : f32 to vector<1x8x8xf32>
    %403 = arith.mulf %400, %402 : vector<1x8x8xf32>
    %404 = arith.addf %394, %403 : vector<1x8x8xf32>
    %c123 = arith.constant 123 : index
    %405 = memref.load %arg1[%c123] : memref<144xf32, #tpu.memory_space<smem>>
    %406 = vector.broadcast %405 : f32 to vector<1x8x8xf32>
    %407 = arith.mulf %400, %406 : vector<1x8x8xf32>
    %408 = arith.addf %398, %407 : vector<1x8x8xf32>
    %c0_112 = arith.constant 0 : index
    %c28 = arith.constant 28 : index
    %c0_113 = arith.constant 0 : index
    %c0_114 = arith.constant 0 : index
    %409 = vector.load %arg2[%c0_112, %c28, %c0_113, %c0_114] : memref<1x64x8x8xf32, #tpu.memory_space<vmem>>, vector<1x1x8x8xf32>
    %410 = vector.shape_cast %409 : vector<1x1x8x8xf32> to vector<1x8x8xf32>
    %c28_115 = arith.constant 28 : index
    %411 = memref.load %arg1[%c28_115] : memref<144xf32, #tpu.memory_space<smem>>
    %412 = vector.broadcast %411 : f32 to vector<1x8x8xf32>
    %413 = arith.mulf %410, %412 : vector<1x8x8xf32>
    %414 = arith.addf %404, %413 : vector<1x8x8xf32>
    %c124 = arith.constant 124 : index
    %415 = memref.load %arg1[%c124] : memref<144xf32, #tpu.memory_space<smem>>
    %416 = vector.broadcast %415 : f32 to vector<1x8x8xf32>
    %417 = arith.mulf %410, %416 : vector<1x8x8xf32>
    %418 = arith.addf %408, %417 : vector<1x8x8xf32>
    %c0_116 = arith.constant 0 : index
    %c29 = arith.constant 29 : index
    %c0_117 = arith.constant 0 : index
    %c0_118 = arith.constant 0 : index
    %419 = vector.load %arg2[%c0_116, %c29, %c0_117, %c0_118] : memref<1x64x8x8xf32, #tpu.memory_space<vmem>>, vector<1x1x8x8xf32>
    %420 = vector.shape_cast %419 : vector<1x1x8x8xf32> to vector<1x8x8xf32>
    %c29_119 = arith.constant 29 : index
    %421 = memref.load %arg1[%c29_119] : memref<144xf32, #tpu.memory_space<smem>>
    %422 = vector.broadcast %421 : f32 to vector<1x8x8xf32>
    %423 = arith.mulf %420, %422 : vector<1x8x8xf32>
    %424 = arith.addf %414, %423 : vector<1x8x8xf32>
    %c125 = arith.constant 125 : index
    %425 = memref.load %arg1[%c125] : memref<144xf32, #tpu.memory_space<smem>>
    %426 = vector.broadcast %425 : f32 to vector<1x8x8xf32>
    %427 = arith.mulf %420, %426 : vector<1x8x8xf32>
    %428 = arith.addf %418, %427 : vector<1x8x8xf32>
    %c0_120 = arith.constant 0 : index
    %c30 = arith.constant 30 : index
    %c0_121 = arith.constant 0 : index
    %c0_122 = arith.constant 0 : index
    %429 = vector.load %arg2[%c0_120, %c30, %c0_121, %c0_122] : memref<1x64x8x8xf32, #tpu.memory_space<vmem>>, vector<1x1x8x8xf32>
    %430 = vector.shape_cast %429 : vector<1x1x8x8xf32> to vector<1x8x8xf32>
    %c30_123 = arith.constant 30 : index
    %431 = memref.load %arg1[%c30_123] : memref<144xf32, #tpu.memory_space<smem>>
    %432 = vector.broadcast %431 : f32 to vector<1x8x8xf32>
    %433 = arith.mulf %430, %432 : vector<1x8x8xf32>
    %434 = arith.addf %424, %433 : vector<1x8x8xf32>
    %c126 = arith.constant 126 : index
    %435 = memref.load %arg1[%c126] : memref<144xf32, #tpu.memory_space<smem>>
    %436 = vector.broadcast %435 : f32 to vector<1x8x8xf32>
    %437 = arith.mulf %430, %436 : vector<1x8x8xf32>
    %438 = arith.addf %428, %437 : vector<1x8x8xf32>
    %c0_124 = arith.constant 0 : index
    %c31 = arith.constant 31 : index
    %c0_125 = arith.constant 0 : index
    %c0_126 = arith.constant 0 : index
    %439 = vector.load %arg2[%c0_124, %c31, %c0_125, %c0_126] : memref<1x64x8x8xf32, #tpu.memory_space<vmem>>, vector<1x1x8x8xf32>
    %440 = vector.shape_cast %439 : vector<1x1x8x8xf32> to vector<1x8x8xf32>
    %c31_127 = arith.constant 31 : index
    %441 = memref.load %arg1[%c31_127] : memref<144xf32, #tpu.memory_space<smem>>
    %442 = vector.broadcast %441 : f32 to vector<1x8x8xf32>
    %443 = arith.mulf %440, %442 : vector<1x8x8xf32>
    %444 = arith.addf %434, %443 : vector<1x8x8xf32>
    %c127 = arith.constant 127 : index
    %445 = memref.load %arg1[%c127] : memref<144xf32, #tpu.memory_space<smem>>
    %446 = vector.broadcast %445 : f32 to vector<1x8x8xf32>
    %447 = arith.mulf %440, %446 : vector<1x8x8xf32>
    %448 = arith.addf %438, %447 : vector<1x8x8xf32>
    %449 = vector.extract_strided_slice %444 {offsets = [0, 0, 0], sizes = [1, 7, 7], strides = [1, 1, 1]} : vector<1x8x8xf32> to vector<1x7x7xf32>
    %450 = arith.addf %290, %449 : vector<1x7x7xf32>
    %451 = vector.extract_strided_slice %448 {offsets = [0, 1, 0], sizes = [1, 7, 7], strides = [1, 1, 1]} : vector<1x8x8xf32> to vector<1x7x7xf32>
    %452 = arith.addf %450, %451 : vector<1x7x7xf32>
    %c0_128 = arith.constant 0 : index
    %c32_129 = arith.constant 32 : index
    %c0_130 = arith.constant 0 : index
    %c0_131 = arith.constant 0 : index
    %453 = vector.load %arg2[%c0_128, %c32_129, %c0_130, %c0_131] : memref<1x64x8x8xf32, #tpu.memory_space<vmem>>, vector<1x1x8x8xf32>
    %454 = vector.shape_cast %453 : vector<1x1x8x8xf32> to vector<1x8x8xf32>
    %c48 = arith.constant 48 : index
    %455 = memref.load %arg1[%c48] : memref<144xf32, #tpu.memory_space<smem>>
    %456 = vector.broadcast %455 : f32 to vector<1x8x8xf32>
    %457 = arith.mulf %454, %456 : vector<1x8x8xf32>
    %c80 = arith.constant 80 : index
    %458 = memref.load %arg1[%c80] : memref<144xf32, #tpu.memory_space<smem>>
    %459 = vector.broadcast %458 : f32 to vector<1x8x8xf32>
    %460 = arith.mulf %454, %459 : vector<1x8x8xf32>
    %c0_132 = arith.constant 0 : index
    %c33_133 = arith.constant 33 : index
    %c0_134 = arith.constant 0 : index
    %c0_135 = arith.constant 0 : index
    %461 = vector.load %arg2[%c0_132, %c33_133, %c0_134, %c0_135] : memref<1x64x8x8xf32, #tpu.memory_space<vmem>>, vector<1x1x8x8xf32>
    %462 = vector.shape_cast %461 : vector<1x1x8x8xf32> to vector<1x8x8xf32>
    %c49 = arith.constant 49 : index
    %463 = memref.load %arg1[%c49] : memref<144xf32, #tpu.memory_space<smem>>
    %464 = vector.broadcast %463 : f32 to vector<1x8x8xf32>
    %465 = arith.mulf %462, %464 : vector<1x8x8xf32>
    %466 = arith.addf %457, %465 : vector<1x8x8xf32>
    %c81 = arith.constant 81 : index
    %467 = memref.load %arg1[%c81] : memref<144xf32, #tpu.memory_space<smem>>
    %468 = vector.broadcast %467 : f32 to vector<1x8x8xf32>
    %469 = arith.mulf %462, %468 : vector<1x8x8xf32>
    %470 = arith.addf %460, %469 : vector<1x8x8xf32>
    %c0_136 = arith.constant 0 : index
    %c34_137 = arith.constant 34 : index
    %c0_138 = arith.constant 0 : index
    %c0_139 = arith.constant 0 : index
    %471 = vector.load %arg2[%c0_136, %c34_137, %c0_138, %c0_139] : memref<1x64x8x8xf32, #tpu.memory_space<vmem>>, vector<1x1x8x8xf32>
    %472 = vector.shape_cast %471 : vector<1x1x8x8xf32> to vector<1x8x8xf32>
    %c50 = arith.constant 50 : index
    %473 = memref.load %arg1[%c50] : memref<144xf32, #tpu.memory_space<smem>>
    %474 = vector.broadcast %473 : f32 to vector<1x8x8xf32>
    %475 = arith.mulf %472, %474 : vector<1x8x8xf32>
    %476 = arith.addf %466, %475 : vector<1x8x8xf32>
    %c82 = arith.constant 82 : index
    %477 = memref.load %arg1[%c82] : memref<144xf32, #tpu.memory_space<smem>>
    %478 = vector.broadcast %477 : f32 to vector<1x8x8xf32>
    %479 = arith.mulf %472, %478 : vector<1x8x8xf32>
    %480 = arith.addf %470, %479 : vector<1x8x8xf32>
    %c0_140 = arith.constant 0 : index
    %c35_141 = arith.constant 35 : index
    %c0_142 = arith.constant 0 : index
    %c0_143 = arith.constant 0 : index
    %481 = vector.load %arg2[%c0_140, %c35_141, %c0_142, %c0_143] : memref<1x64x8x8xf32, #tpu.memory_space<vmem>>, vector<1x1x8x8xf32>
    %482 = vector.shape_cast %481 : vector<1x1x8x8xf32> to vector<1x8x8xf32>
    %c51 = arith.constant 51 : index
    %483 = memref.load %arg1[%c51] : memref<144xf32, #tpu.memory_space<smem>>
    %484 = vector.broadcast %483 : f32 to vector<1x8x8xf32>
    %485 = arith.mulf %482, %484 : vector<1x8x8xf32>
    %486 = arith.addf %476, %485 : vector<1x8x8xf32>
    %c83 = arith.constant 83 : index
    %487 = memref.load %arg1[%c83] : memref<144xf32, #tpu.memory_space<smem>>
    %488 = vector.broadcast %487 : f32 to vector<1x8x8xf32>
    %489 = arith.mulf %482, %488 : vector<1x8x8xf32>
    %490 = arith.addf %480, %489 : vector<1x8x8xf32>
    %c0_144 = arith.constant 0 : index
    %c36_145 = arith.constant 36 : index
    %c0_146 = arith.constant 0 : index
    %c0_147 = arith.constant 0 : index
    %491 = vector.load %arg2[%c0_144, %c36_145, %c0_146, %c0_147] : memref<1x64x8x8xf32, #tpu.memory_space<vmem>>, vector<1x1x8x8xf32>
    %492 = vector.shape_cast %491 : vector<1x1x8x8xf32> to vector<1x8x8xf32>
    %c52 = arith.constant 52 : index
    %493 = memref.load %arg1[%c52] : memref<144xf32, #tpu.memory_space<smem>>
    %494 = vector.broadcast %493 : f32 to vector<1x8x8xf32>
    %495 = arith.mulf %492, %494 : vector<1x8x8xf32>
    %496 = arith.addf %486, %495 : vector<1x8x8xf32>
    %c84 = arith.constant 84 : index
    %497 = memref.load %arg1[%c84] : memref<144xf32, #tpu.memory_space<smem>>
    %498 = vector.broadcast %497 : f32 to vector<1x8x8xf32>
    %499 = arith.mulf %492, %498 : vector<1x8x8xf32>
    %500 = arith.addf %490, %499 : vector<1x8x8xf32>
    %c0_148 = arith.constant 0 : index
    %c37_149 = arith.constant 37 : index
    %c0_150 = arith.constant 0 : index
    %c0_151 = arith.constant 0 : index
    %501 = vector.load %arg2[%c0_148, %c37_149, %c0_150, %c0_151] : memref<1x64x8x8xf32, #tpu.memory_space<vmem>>, vector<1x1x8x8xf32>
    %502 = vector.shape_cast %501 : vector<1x1x8x8xf32> to vector<1x8x8xf32>
    %c53 = arith.constant 53 : index
    %503 = memref.load %arg1[%c53] : memref<144xf32, #tpu.memory_space<smem>>
    %504 = vector.broadcast %503 : f32 to vector<1x8x8xf32>
    %505 = arith.mulf %502, %504 : vector<1x8x8xf32>
    %506 = arith.addf %496, %505 : vector<1x8x8xf32>
    %c85 = arith.constant 85 : index
    %507 = memref.load %arg1[%c85] : memref<144xf32, #tpu.memory_space<smem>>
    %508 = vector.broadcast %507 : f32 to vector<1x8x8xf32>
    %509 = arith.mulf %502, %508 : vector<1x8x8xf32>
    %510 = arith.addf %500, %509 : vector<1x8x8xf32>
    %c0_152 = arith.constant 0 : index
    %c38_153 = arith.constant 38 : index
    %c0_154 = arith.constant 0 : index
    %c0_155 = arith.constant 0 : index
    %511 = vector.load %arg2[%c0_152, %c38_153, %c0_154, %c0_155] : memref<1x64x8x8xf32, #tpu.memory_space<vmem>>, vector<1x1x8x8xf32>
    %512 = vector.shape_cast %511 : vector<1x1x8x8xf32> to vector<1x8x8xf32>
    %c54 = arith.constant 54 : index
    %513 = memref.load %arg1[%c54] : memref<144xf32, #tpu.memory_space<smem>>
    %514 = vector.broadcast %513 : f32 to vector<1x8x8xf32>
    %515 = arith.mulf %512, %514 : vector<1x8x8xf32>
    %516 = arith.addf %506, %515 : vector<1x8x8xf32>
    %c86 = arith.constant 86 : index
    %517 = memref.load %arg1[%c86] : memref<144xf32, #tpu.memory_space<smem>>
    %518 = vector.broadcast %517 : f32 to vector<1x8x8xf32>
    %519 = arith.mulf %512, %518 : vector<1x8x8xf32>
    %520 = arith.addf %510, %519 : vector<1x8x8xf32>
    %c0_156 = arith.constant 0 : index
    %c39_157 = arith.constant 39 : index
    %c0_158 = arith.constant 0 : index
    %c0_159 = arith.constant 0 : index
    %521 = vector.load %arg2[%c0_156, %c39_157, %c0_158, %c0_159] : memref<1x64x8x8xf32, #tpu.memory_space<vmem>>, vector<1x1x8x8xf32>
    %522 = vector.shape_cast %521 : vector<1x1x8x8xf32> to vector<1x8x8xf32>
    %c55 = arith.constant 55 : index
    %523 = memref.load %arg1[%c55] : memref<144xf32, #tpu.memory_space<smem>>
    %524 = vector.broadcast %523 : f32 to vector<1x8x8xf32>
    %525 = arith.mulf %522, %524 : vector<1x8x8xf32>
    %526 = arith.addf %516, %525 : vector<1x8x8xf32>
    %c87 = arith.constant 87 : index
    %527 = memref.load %arg1[%c87] : memref<144xf32, #tpu.memory_space<smem>>
    %528 = vector.broadcast %527 : f32 to vector<1x8x8xf32>
    %529 = arith.mulf %522, %528 : vector<1x8x8xf32>
    %530 = arith.addf %520, %529 : vector<1x8x8xf32>
    %c0_160 = arith.constant 0 : index
    %c40_161 = arith.constant 40 : index
    %c0_162 = arith.constant 0 : index
    %c0_163 = arith.constant 0 : index
    %531 = vector.load %arg2[%c0_160, %c40_161, %c0_162, %c0_163] : memref<1x64x8x8xf32, #tpu.memory_space<vmem>>, vector<1x1x8x8xf32>
    %532 = vector.shape_cast %531 : vector<1x1x8x8xf32> to vector<1x8x8xf32>
    %c56 = arith.constant 56 : index
    %533 = memref.load %arg1[%c56] : memref<144xf32, #tpu.memory_space<smem>>
    %534 = vector.broadcast %533 : f32 to vector<1x8x8xf32>
    %535 = arith.mulf %532, %534 : vector<1x8x8xf32>
    %536 = arith.addf %526, %535 : vector<1x8x8xf32>
    %c88 = arith.constant 88 : index
    %537 = memref.load %arg1[%c88] : memref<144xf32, #tpu.memory_space<smem>>
    %538 = vector.broadcast %537 : f32 to vector<1x8x8xf32>
    %539 = arith.mulf %532, %538 : vector<1x8x8xf32>
    %540 = arith.addf %530, %539 : vector<1x8x8xf32>
    %c0_164 = arith.constant 0 : index
    %c41_165 = arith.constant 41 : index
    %c0_166 = arith.constant 0 : index
    %c0_167 = arith.constant 0 : index
    %541 = vector.load %arg2[%c0_164, %c41_165, %c0_166, %c0_167] : memref<1x64x8x8xf32, #tpu.memory_space<vmem>>, vector<1x1x8x8xf32>
    %542 = vector.shape_cast %541 : vector<1x1x8x8xf32> to vector<1x8x8xf32>
    %c57 = arith.constant 57 : index
    %543 = memref.load %arg1[%c57] : memref<144xf32, #tpu.memory_space<smem>>
    %544 = vector.broadcast %543 : f32 to vector<1x8x8xf32>
    %545 = arith.mulf %542, %544 : vector<1x8x8xf32>
    %546 = arith.addf %536, %545 : vector<1x8x8xf32>
    %c89 = arith.constant 89 : index
    %547 = memref.load %arg1[%c89] : memref<144xf32, #tpu.memory_space<smem>>
    %548 = vector.broadcast %547 : f32 to vector<1x8x8xf32>
    %549 = arith.mulf %542, %548 : vector<1x8x8xf32>
    %550 = arith.addf %540, %549 : vector<1x8x8xf32>
    %c0_168 = arith.constant 0 : index
    %c42_169 = arith.constant 42 : index
    %c0_170 = arith.constant 0 : index
    %c0_171 = arith.constant 0 : index
    %551 = vector.load %arg2[%c0_168, %c42_169, %c0_170, %c0_171] : memref<1x64x8x8xf32, #tpu.memory_space<vmem>>, vector<1x1x8x8xf32>
    %552 = vector.shape_cast %551 : vector<1x1x8x8xf32> to vector<1x8x8xf32>
    %c58 = arith.constant 58 : index
    %553 = memref.load %arg1[%c58] : memref<144xf32, #tpu.memory_space<smem>>
    %554 = vector.broadcast %553 : f32 to vector<1x8x8xf32>
    %555 = arith.mulf %552, %554 : vector<1x8x8xf32>
    %556 = arith.addf %546, %555 : vector<1x8x8xf32>
    %c90 = arith.constant 90 : index
    %557 = memref.load %arg1[%c90] : memref<144xf32, #tpu.memory_space<smem>>
    %558 = vector.broadcast %557 : f32 to vector<1x8x8xf32>
    %559 = arith.mulf %552, %558 : vector<1x8x8xf32>
    %560 = arith.addf %550, %559 : vector<1x8x8xf32>
    %c0_172 = arith.constant 0 : index
    %c43_173 = arith.constant 43 : index
    %c0_174 = arith.constant 0 : index
    %c0_175 = arith.constant 0 : index
    %561 = vector.load %arg2[%c0_172, %c43_173, %c0_174, %c0_175] : memref<1x64x8x8xf32, #tpu.memory_space<vmem>>, vector<1x1x8x8xf32>
    %562 = vector.shape_cast %561 : vector<1x1x8x8xf32> to vector<1x8x8xf32>
    %c59 = arith.constant 59 : index
    %563 = memref.load %arg1[%c59] : memref<144xf32, #tpu.memory_space<smem>>
    %564 = vector.broadcast %563 : f32 to vector<1x8x8xf32>
    %565 = arith.mulf %562, %564 : vector<1x8x8xf32>
    %566 = arith.addf %556, %565 : vector<1x8x8xf32>
    %c91 = arith.constant 91 : index
    %567 = memref.load %arg1[%c91] : memref<144xf32, #tpu.memory_space<smem>>
    %568 = vector.broadcast %567 : f32 to vector<1x8x8xf32>
    %569 = arith.mulf %562, %568 : vector<1x8x8xf32>
    %570 = arith.addf %560, %569 : vector<1x8x8xf32>
    %c0_176 = arith.constant 0 : index
    %c44_177 = arith.constant 44 : index
    %c0_178 = arith.constant 0 : index
    %c0_179 = arith.constant 0 : index
    %571 = vector.load %arg2[%c0_176, %c44_177, %c0_178, %c0_179] : memref<1x64x8x8xf32, #tpu.memory_space<vmem>>, vector<1x1x8x8xf32>
    %572 = vector.shape_cast %571 : vector<1x1x8x8xf32> to vector<1x8x8xf32>
    %c60 = arith.constant 60 : index
    %573 = memref.load %arg1[%c60] : memref<144xf32, #tpu.memory_space<smem>>
    %574 = vector.broadcast %573 : f32 to vector<1x8x8xf32>
    %575 = arith.mulf %572, %574 : vector<1x8x8xf32>
    %576 = arith.addf %566, %575 : vector<1x8x8xf32>
    %c92 = arith.constant 92 : index
    %577 = memref.load %arg1[%c92] : memref<144xf32, #tpu.memory_space<smem>>
    %578 = vector.broadcast %577 : f32 to vector<1x8x8xf32>
    %579 = arith.mulf %572, %578 : vector<1x8x8xf32>
    %580 = arith.addf %570, %579 : vector<1x8x8xf32>
    %c0_180 = arith.constant 0 : index
    %c45_181 = arith.constant 45 : index
    %c0_182 = arith.constant 0 : index
    %c0_183 = arith.constant 0 : index
    %581 = vector.load %arg2[%c0_180, %c45_181, %c0_182, %c0_183] : memref<1x64x8x8xf32, #tpu.memory_space<vmem>>, vector<1x1x8x8xf32>
    %582 = vector.shape_cast %581 : vector<1x1x8x8xf32> to vector<1x8x8xf32>
    %c61 = arith.constant 61 : index
    %583 = memref.load %arg1[%c61] : memref<144xf32, #tpu.memory_space<smem>>
    %584 = vector.broadcast %583 : f32 to vector<1x8x8xf32>
    %585 = arith.mulf %582, %584 : vector<1x8x8xf32>
    %586 = arith.addf %576, %585 : vector<1x8x8xf32>
    %c93 = arith.constant 93 : index
    %587 = memref.load %arg1[%c93] : memref<144xf32, #tpu.memory_space<smem>>
    %588 = vector.broadcast %587 : f32 to vector<1x8x8xf32>
    %589 = arith.mulf %582, %588 : vector<1x8x8xf32>
    %590 = arith.addf %580, %589 : vector<1x8x8xf32>
    %c0_184 = arith.constant 0 : index
    %c46_185 = arith.constant 46 : index
    %c0_186 = arith.constant 0 : index
    %c0_187 = arith.constant 0 : index
    %591 = vector.load %arg2[%c0_184, %c46_185, %c0_186, %c0_187] : memref<1x64x8x8xf32, #tpu.memory_space<vmem>>, vector<1x1x8x8xf32>
    %592 = vector.shape_cast %591 : vector<1x1x8x8xf32> to vector<1x8x8xf32>
    %c62 = arith.constant 62 : index
    %593 = memref.load %arg1[%c62] : memref<144xf32, #tpu.memory_space<smem>>
    %594 = vector.broadcast %593 : f32 to vector<1x8x8xf32>
    %595 = arith.mulf %592, %594 : vector<1x8x8xf32>
    %596 = arith.addf %586, %595 : vector<1x8x8xf32>
    %c94 = arith.constant 94 : index
    %597 = memref.load %arg1[%c94] : memref<144xf32, #tpu.memory_space<smem>>
    %598 = vector.broadcast %597 : f32 to vector<1x8x8xf32>
    %599 = arith.mulf %592, %598 : vector<1x8x8xf32>
    %600 = arith.addf %590, %599 : vector<1x8x8xf32>
    %c0_188 = arith.constant 0 : index
    %c47_189 = arith.constant 47 : index
    %c0_190 = arith.constant 0 : index
    %c0_191 = arith.constant 0 : index
    %601 = vector.load %arg2[%c0_188, %c47_189, %c0_190, %c0_191] : memref<1x64x8x8xf32, #tpu.memory_space<vmem>>, vector<1x1x8x8xf32>
    %602 = vector.shape_cast %601 : vector<1x1x8x8xf32> to vector<1x8x8xf32>
    %c63 = arith.constant 63 : index
    %603 = memref.load %arg1[%c63] : memref<144xf32, #tpu.memory_space<smem>>
    %604 = vector.broadcast %603 : f32 to vector<1x8x8xf32>
    %605 = arith.mulf %602, %604 : vector<1x8x8xf32>
    %606 = arith.addf %596, %605 : vector<1x8x8xf32>
    %c95 = arith.constant 95 : index
    %607 = memref.load %arg1[%c95] : memref<144xf32, #tpu.memory_space<smem>>
    %608 = vector.broadcast %607 : f32 to vector<1x8x8xf32>
    %609 = arith.mulf %602, %608 : vector<1x8x8xf32>
    %610 = arith.addf %600, %609 : vector<1x8x8xf32>
    %611 = vector.extract_strided_slice %606 {offsets = [0, 0, 0], sizes = [1, 7, 7], strides = [1, 1, 1]} : vector<1x8x8xf32> to vector<1x7x7xf32>
    %612 = arith.addf %452, %611 : vector<1x7x7xf32>
    %613 = vector.extract_strided_slice %610 {offsets = [0, 0, 1], sizes = [1, 7, 7], strides = [1, 1, 1]} : vector<1x8x8xf32> to vector<1x7x7xf32>
    %614 = arith.addf %612, %613 : vector<1x7x7xf32>
    %c0_192 = arith.constant 0 : index
    %c48_193 = arith.constant 48 : index
    %c0_194 = arith.constant 0 : index
    %c0_195 = arith.constant 0 : index
    %615 = vector.load %arg2[%c0_192, %c48_193, %c0_194, %c0_195] : memref<1x64x8x8xf32, #tpu.memory_space<vmem>>, vector<1x1x8x8xf32>
    %616 = vector.shape_cast %615 : vector<1x1x8x8xf32> to vector<1x8x8xf32>
    %c64 = arith.constant 64 : index
    %617 = memref.load %arg1[%c64] : memref<144xf32, #tpu.memory_space<smem>>
    %618 = vector.broadcast %617 : f32 to vector<1x8x8xf32>
    %619 = arith.mulf %616, %618 : vector<1x8x8xf32>
    %c0_196 = arith.constant 0 : index
    %c49_197 = arith.constant 49 : index
    %c0_198 = arith.constant 0 : index
    %c0_199 = arith.constant 0 : index
    %620 = vector.load %arg2[%c0_196, %c49_197, %c0_198, %c0_199] : memref<1x64x8x8xf32, #tpu.memory_space<vmem>>, vector<1x1x8x8xf32>
    %621 = vector.shape_cast %620 : vector<1x1x8x8xf32> to vector<1x8x8xf32>
    %c65 = arith.constant 65 : index
    %622 = memref.load %arg1[%c65] : memref<144xf32, #tpu.memory_space<smem>>
    %623 = vector.broadcast %622 : f32 to vector<1x8x8xf32>
    %624 = arith.mulf %621, %623 : vector<1x8x8xf32>
    %625 = arith.addf %619, %624 : vector<1x8x8xf32>
    %c0_200 = arith.constant 0 : index
    %c50_201 = arith.constant 50 : index
    %c0_202 = arith.constant 0 : index
    %c0_203 = arith.constant 0 : index
    %626 = vector.load %arg2[%c0_200, %c50_201, %c0_202, %c0_203] : memref<1x64x8x8xf32, #tpu.memory_space<vmem>>, vector<1x1x8x8xf32>
    %627 = vector.shape_cast %626 : vector<1x1x8x8xf32> to vector<1x8x8xf32>
    %c66 = arith.constant 66 : index
    %628 = memref.load %arg1[%c66] : memref<144xf32, #tpu.memory_space<smem>>
    %629 = vector.broadcast %628 : f32 to vector<1x8x8xf32>
    %630 = arith.mulf %627, %629 : vector<1x8x8xf32>
    %631 = arith.addf %625, %630 : vector<1x8x8xf32>
    %c0_204 = arith.constant 0 : index
    %c51_205 = arith.constant 51 : index
    %c0_206 = arith.constant 0 : index
    %c0_207 = arith.constant 0 : index
    %632 = vector.load %arg2[%c0_204, %c51_205, %c0_206, %c0_207] : memref<1x64x8x8xf32, #tpu.memory_space<vmem>>, vector<1x1x8x8xf32>
    %633 = vector.shape_cast %632 : vector<1x1x8x8xf32> to vector<1x8x8xf32>
    %c67 = arith.constant 67 : index
    %634 = memref.load %arg1[%c67] : memref<144xf32, #tpu.memory_space<smem>>
    %635 = vector.broadcast %634 : f32 to vector<1x8x8xf32>
    %636 = arith.mulf %633, %635 : vector<1x8x8xf32>
    %637 = arith.addf %631, %636 : vector<1x8x8xf32>
    %c0_208 = arith.constant 0 : index
    %c52_209 = arith.constant 52 : index
    %c0_210 = arith.constant 0 : index
    %c0_211 = arith.constant 0 : index
    %638 = vector.load %arg2[%c0_208, %c52_209, %c0_210, %c0_211] : memref<1x64x8x8xf32, #tpu.memory_space<vmem>>, vector<1x1x8x8xf32>
    %639 = vector.shape_cast %638 : vector<1x1x8x8xf32> to vector<1x8x8xf32>
    %c68 = arith.constant 68 : index
    %640 = memref.load %arg1[%c68] : memref<144xf32, #tpu.memory_space<smem>>
    %641 = vector.broadcast %640 : f32 to vector<1x8x8xf32>
    %642 = arith.mulf %639, %641 : vector<1x8x8xf32>
    %643 = arith.addf %637, %642 : vector<1x8x8xf32>
    %c0_212 = arith.constant 0 : index
    %c53_213 = arith.constant 53 : index
    %c0_214 = arith.constant 0 : index
    %c0_215 = arith.constant 0 : index
    %644 = vector.load %arg2[%c0_212, %c53_213, %c0_214, %c0_215] : memref<1x64x8x8xf32, #tpu.memory_space<vmem>>, vector<1x1x8x8xf32>
    %645 = vector.shape_cast %644 : vector<1x1x8x8xf32> to vector<1x8x8xf32>
    %c69 = arith.constant 69 : index
    %646 = memref.load %arg1[%c69] : memref<144xf32, #tpu.memory_space<smem>>
    %647 = vector.broadcast %646 : f32 to vector<1x8x8xf32>
    %648 = arith.mulf %645, %647 : vector<1x8x8xf32>
    %649 = arith.addf %643, %648 : vector<1x8x8xf32>
    %c0_216 = arith.constant 0 : index
    %c54_217 = arith.constant 54 : index
    %c0_218 = arith.constant 0 : index
    %c0_219 = arith.constant 0 : index
    %650 = vector.load %arg2[%c0_216, %c54_217, %c0_218, %c0_219] : memref<1x64x8x8xf32, #tpu.memory_space<vmem>>, vector<1x1x8x8xf32>
    %651 = vector.shape_cast %650 : vector<1x1x8x8xf32> to vector<1x8x8xf32>
    %c70 = arith.constant 70 : index
    %652 = memref.load %arg1[%c70] : memref<144xf32, #tpu.memory_space<smem>>
    %653 = vector.broadcast %652 : f32 to vector<1x8x8xf32>
    %654 = arith.mulf %651, %653 : vector<1x8x8xf32>
    %655 = arith.addf %649, %654 : vector<1x8x8xf32>
    %c0_220 = arith.constant 0 : index
    %c55_221 = arith.constant 55 : index
    %c0_222 = arith.constant 0 : index
    %c0_223 = arith.constant 0 : index
    %656 = vector.load %arg2[%c0_220, %c55_221, %c0_222, %c0_223] : memref<1x64x8x8xf32, #tpu.memory_space<vmem>>, vector<1x1x8x8xf32>
    %657 = vector.shape_cast %656 : vector<1x1x8x8xf32> to vector<1x8x8xf32>
    %c71 = arith.constant 71 : index
    %658 = memref.load %arg1[%c71] : memref<144xf32, #tpu.memory_space<smem>>
    %659 = vector.broadcast %658 : f32 to vector<1x8x8xf32>
    %660 = arith.mulf %657, %659 : vector<1x8x8xf32>
    %661 = arith.addf %655, %660 : vector<1x8x8xf32>
    %c0_224 = arith.constant 0 : index
    %c56_225 = arith.constant 56 : index
    %c0_226 = arith.constant 0 : index
    %c0_227 = arith.constant 0 : index
    %662 = vector.load %arg2[%c0_224, %c56_225, %c0_226, %c0_227] : memref<1x64x8x8xf32, #tpu.memory_space<vmem>>, vector<1x1x8x8xf32>
    %663 = vector.shape_cast %662 : vector<1x1x8x8xf32> to vector<1x8x8xf32>
    %c72 = arith.constant 72 : index
    %664 = memref.load %arg1[%c72] : memref<144xf32, #tpu.memory_space<smem>>
    %665 = vector.broadcast %664 : f32 to vector<1x8x8xf32>
    %666 = arith.mulf %663, %665 : vector<1x8x8xf32>
    %667 = arith.addf %661, %666 : vector<1x8x8xf32>
    %c0_228 = arith.constant 0 : index
    %c57_229 = arith.constant 57 : index
    %c0_230 = arith.constant 0 : index
    %c0_231 = arith.constant 0 : index
    %668 = vector.load %arg2[%c0_228, %c57_229, %c0_230, %c0_231] : memref<1x64x8x8xf32, #tpu.memory_space<vmem>>, vector<1x1x8x8xf32>
    %669 = vector.shape_cast %668 : vector<1x1x8x8xf32> to vector<1x8x8xf32>
    %c73 = arith.constant 73 : index
    %670 = memref.load %arg1[%c73] : memref<144xf32, #tpu.memory_space<smem>>
    %671 = vector.broadcast %670 : f32 to vector<1x8x8xf32>
    %672 = arith.mulf %669, %671 : vector<1x8x8xf32>
    %673 = arith.addf %667, %672 : vector<1x8x8xf32>
    %c0_232 = arith.constant 0 : index
    %c58_233 = arith.constant 58 : index
    %c0_234 = arith.constant 0 : index
    %c0_235 = arith.constant 0 : index
    %674 = vector.load %arg2[%c0_232, %c58_233, %c0_234, %c0_235] : memref<1x64x8x8xf32, #tpu.memory_space<vmem>>, vector<1x1x8x8xf32>
    %675 = vector.shape_cast %674 : vector<1x1x8x8xf32> to vector<1x8x8xf32>
    %c74 = arith.constant 74 : index
    %676 = memref.load %arg1[%c74] : memref<144xf32, #tpu.memory_space<smem>>
    %677 = vector.broadcast %676 : f32 to vector<1x8x8xf32>
    %678 = arith.mulf %675, %677 : vector<1x8x8xf32>
    %679 = arith.addf %673, %678 : vector<1x8x8xf32>
    %c0_236 = arith.constant 0 : index
    %c59_237 = arith.constant 59 : index
    %c0_238 = arith.constant 0 : index
    %c0_239 = arith.constant 0 : index
    %680 = vector.load %arg2[%c0_236, %c59_237, %c0_238, %c0_239] : memref<1x64x8x8xf32, #tpu.memory_space<vmem>>, vector<1x1x8x8xf32>
    %681 = vector.shape_cast %680 : vector<1x1x8x8xf32> to vector<1x8x8xf32>
    %c75 = arith.constant 75 : index
    %682 = memref.load %arg1[%c75] : memref<144xf32, #tpu.memory_space<smem>>
    %683 = vector.broadcast %682 : f32 to vector<1x8x8xf32>
    %684 = arith.mulf %681, %683 : vector<1x8x8xf32>
    %685 = arith.addf %679, %684 : vector<1x8x8xf32>
    %c0_240 = arith.constant 0 : index
    %c60_241 = arith.constant 60 : index
    %c0_242 = arith.constant 0 : index
    %c0_243 = arith.constant 0 : index
    %686 = vector.load %arg2[%c0_240, %c60_241, %c0_242, %c0_243] : memref<1x64x8x8xf32, #tpu.memory_space<vmem>>, vector<1x1x8x8xf32>
    %687 = vector.shape_cast %686 : vector<1x1x8x8xf32> to vector<1x8x8xf32>
    %c76 = arith.constant 76 : index
    %688 = memref.load %arg1[%c76] : memref<144xf32, #tpu.memory_space<smem>>
    %689 = vector.broadcast %688 : f32 to vector<1x8x8xf32>
    %690 = arith.mulf %687, %689 : vector<1x8x8xf32>
    %691 = arith.addf %685, %690 : vector<1x8x8xf32>
    %c0_244 = arith.constant 0 : index
    %c61_245 = arith.constant 61 : index
    %c0_246 = arith.constant 0 : index
    %c0_247 = arith.constant 0 : index
    %692 = vector.load %arg2[%c0_244, %c61_245, %c0_246, %c0_247] : memref<1x64x8x8xf32, #tpu.memory_space<vmem>>, vector<1x1x8x8xf32>
    %693 = vector.shape_cast %692 : vector<1x1x8x8xf32> to vector<1x8x8xf32>
    %c77 = arith.constant 77 : index
    %694 = memref.load %arg1[%c77] : memref<144xf32, #tpu.memory_space<smem>>
    %695 = vector.broadcast %694 : f32 to vector<1x8x8xf32>
    %696 = arith.mulf %693, %695 : vector<1x8x8xf32>
    %697 = arith.addf %691, %696 : vector<1x8x8xf32>
    %c0_248 = arith.constant 0 : index
    %c62_249 = arith.constant 62 : index
    %c0_250 = arith.constant 0 : index
    %c0_251 = arith.constant 0 : index
    %698 = vector.load %arg2[%c0_248, %c62_249, %c0_250, %c0_251] : memref<1x64x8x8xf32, #tpu.memory_space<vmem>>, vector<1x1x8x8xf32>
    %699 = vector.shape_cast %698 : vector<1x1x8x8xf32> to vector<1x8x8xf32>
    %c78 = arith.constant 78 : index
    %700 = memref.load %arg1[%c78] : memref<144xf32, #tpu.memory_space<smem>>
    %701 = vector.broadcast %700 : f32 to vector<1x8x8xf32>
    %702 = arith.mulf %699, %701 : vector<1x8x8xf32>
    %703 = arith.addf %697, %702 : vector<1x8x8xf32>
    %c0_252 = arith.constant 0 : index
    %c63_253 = arith.constant 63 : index
    %c0_254 = arith.constant 0 : index
    %c0_255 = arith.constant 0 : index
    %704 = vector.load %arg2[%c0_252, %c63_253, %c0_254, %c0_255] : memref<1x64x8x8xf32, #tpu.memory_space<vmem>>, vector<1x1x8x8xf32>
    %705 = vector.shape_cast %704 : vector<1x1x8x8xf32> to vector<1x8x8xf32>
    %c79 = arith.constant 79 : index
    %706 = memref.load %arg1[%c79] : memref<144xf32, #tpu.memory_space<smem>>
    %707 = vector.broadcast %706 : f32 to vector<1x8x8xf32>
    %708 = arith.mulf %705, %707 : vector<1x8x8xf32>
    %709 = arith.addf %703, %708 : vector<1x8x8xf32>
    %710 = vector.extract_strided_slice %709 {offsets = [0, 0, 0], sizes = [1, 7, 7], strides = [1, 1, 1]} : vector<1x8x8xf32> to vector<1x7x7xf32>
    %711 = arith.addf %614, %710 : vector<1x7x7xf32>
    %c0_256 = arith.constant 0 : index
    %c0_257 = arith.constant 0 : index
    %c0_258 = arith.constant 0 : index
    %712 = vector.load %arg3[%c0_256, %c0_257, %c0_258] : memref<1x7x7xf32, #tpu.memory_space<vmem>>, vector<1x7x7xf32>
    tpu.vector_store %arg3[%c0_256, %c0_257, %c0_258], %711 {strides = array<i32>} : memref<1x7x7xf32, #tpu.memory_space<vmem>>, vector<1x7x7xf32>,
    return
  }
  func.func @transform_0(%arg0: i32) -> i32 {
    %c0_i32 = arith.constant 0 : i32
    %c0_i32_0 = arith.constant 0 : i32
    return %c0_i32 : i32
  }
  func.func @transform_1(%arg0: i32) -> (i32, i32, i32, i32) {
    %c0_i32 = arith.constant 0 : i32
    %c0_i32_0 = arith.constant 0 : i32
    %c0_i32_1 = arith.constant 0 : i32
    %c0_i32_2 = arith.constant 0 : i32
    return %arg0, %c0_i32, %c0_i32_0, %c0_i32_1 : i32, i32, i32, i32
  }
  func.func @transform_2(%arg0: i32) -> (i32, i32, i32) {
    %c0_i32 = arith.constant 0 : i32
    %c0_i32_0 = arith.constant 0 : i32
    %c0_i32_1 = arith.constant 0 : i32
    return %arg0, %c0_i32, %c0_i32_0 : i32, i32, i32
  }
}

</mosaic_0001>

<bundles_post_ra>
// kernel: tpu_custom_call.1
= control target key start
LH: loop header
LB: loop body
LE: loop exit
PB: predicated region body
PF: predicated region fallthrough
CT: control target
= control target key end

     0   :  { %9 = vsyncpa [#allocation4], 0  ;;  %s1040_s0 = inlined_call_operand.vmem [shape: f32[16], index: 0, kind: input, shape index: {}]   ;;  %s1041_s1 = inlined_call_operand.hbm [shape: f32[2,16,16,16], index: 1, kind: input, shape index: {}]   ;;  %s1042_s2 = inlined_call_operand.vmem [shape: f32[3,7,16], index: 2, kind: input, shape index: {}]   ;;  %s1043_s3 = inlined_call_operand.vmem [shape: f32[3,16,7], index: 3, kind: input, shape index: {}]   ;;  %s1044_s4 = inlined_call_operand.vmem [shape: f32[2,7,7], index: 4, kind: output, shape index: {}]  }
   0x1   :  { %10 = vsyncpa [#allocation3], 0 }
   0x2   :  { %12 = vsyncpa [#allocation3 + $0x1], 0  ;;  %s841_s15 = smov 0   ;;  %s843_s16 = smov 0  }
   0x3   :  { %s845_s17 = smov 0   ;;  %s847_s18 = smov 0  }
   0x4 LB: > { %s857_s19 = sadd.s32 4294967295, %s811_s18   ;;  %s859_s20 = sadd.s32 1, %s811_s18   ;;  %s811_s18 = sphi %s847_s18, %s1051_s18   ;;  %s807_s17 = sphi %s845_s17, %s1050_s17   ;;  %s803_s16 = sphi %s843_s16, %s1049_s16   ;;  %s799_s15 = sphi %s841_s15, %s1048_s15  }
   0x5   : > { %s43_s21 = ssub.s32 %s811_s18, %s859_s20  ;;  %s46_s22 = sadd.s32 1, %s807_s17 }
   0x6   : > { %p44_p0 = scmp.eq.s32.totalorder %s43_s21, 0  ;;  %p53_p1 = scmp.ne.s32.totalorder %s807_s17, %s803_s16 }
   0x7   : > { %p54_p2 = scmp.eq.s32.totalorder %s811_s18, 0  ;;  %p59_p3 = scmp.ne.s32.totalorder %s803_s16, %s799_s15 }
   0x8   : > { %s867_s23 = scalar_select %p44_p0, %s807_s17, %s46_s22  }
   0x9   : > { %p55_p4 = por %p54_p2, %p53_p1  ;;  %p60_p5 = scmp.eq.s32.totalorder %s857_s19, 0 }
   0xa   : > { %p606_p6 = scmp.ge.s32.totalorder %s811_s18, 1  ;;  %p138_p7 = scmp.lt.s32.totalorder %s811_s18, 3 }
   0xb   : > { %p872_p8 = por %p60_p5, %p59_p3  ;;  %s150_s28 = sshll.u32 %s1040_s0, 4  ;;  %s151_s28 = int_to_ptr.vmem [resolvable:$true] %s150_s28 }
   0xc   : > { %p876_p9 = pnand %p606_p6, %p138_p7  ;;  %p691_p11 = scmp.lt.s32.totalorder %s811_s18, 2 }
   0xd   : > { %s167_s29 = sand.u32 1, %s807_s17   ;;  %s813_s6 = smov [#allocation2]  }
   0xe   : > { %p682_p10 = pneg %p876_p9  ;;  %p888_p13 = pnand %p691_p11, %p55_p4 }
   0xf   : > { %s609_s5 = sshll.u32 %s167_s29, 8  ;;  %s675_s7 = sshll.u32 %s811_s18, 8 }
  0x10   : > { %p683_p12 = pnand %p682_p10, %p60_p5  ;;  %s176_s10 = scalar_lea.hbm %s1041_s1, %s675_s7 }
  0x11   : > { %s171_s11 = scalar_lea.vmem [#allocation5], %s609_s5  ;;  %s177_s13 = sshll.u32 %s176_s10, 4  ;;  %s178_s13 = int_to_ptr.hbm [resolvable:$true] %s177_s13 }
  0x12   : > { %685 = dma.vmem_to_smem (!%p683_p12), %s151_s28, 16, %s813_s6, [#allocation4]  }
  0x13   : > { %s179_s12 = sshll.u32 %s171_s11, 4  ;;  %s168_s14 = scalar_lea.sflag [#allocation3], %s167_s29  ;;  %s180_s12 = int_to_ptr.vmem [resolvable:$true] %s179_s12 }
  0x14   : > { %s743_s15 = sshra.s32 %s178_s13, 4  ;;  %p747_p1 = pneg %p888_p13  ;;  %s744_s15 = int_to_ptr.hbm [resolvable:$true] %s743_s15 }
  0x15   : > { %s745_s21 = scalar_lea.hbm %s744_s15, 256  ;;  %s750_s26 = scalar_lea.hbm %s1041_s1, 512 }
  0x16   : > { %p746_p0 = scmp.ne.s32.totalorder %s744_s15, %s745_s21  ;;  %p751_p4 = scmp.lt.s32.totalorder %s744_s15, %s1041_s1 }
  0x17   : > { %p752_p6 = scmp.lt.s32.totalorder %s750_s26, %s745_s21 }
  0x18   : > { %p748_p2 = pnand %p747_p1, %p746_p0 }
  0x19   : > { %p753_p7 = por %p752_p6, %p751_p4 }
  0x1a   : > { %p749_p3 = pneg %p748_p2 }
  0x1c   : > { %p754_p10 = pnand %p753_p7, %p749_p3 }
  0x1e   : > { %757 = shalt.err (!%p754_p10)
}
  0x1f   : > { %s814_s29 = smov 128   ;;  %s815_s5 = smov 8  }
  0x20   : > { %689 = dma.hbm_to_vmem [thread:$0]  (!%p888_p13), %s178_s13, 4096, %s180_s12, %s168_s14, %s814_s29, %s814_s29, %s815_s5  }
  0x21   : > { %191 = sbr.rel (%p876_p9) target bundleno = 351 (0x15f), region = 36 }
  0x26   : > { %790 = dma.done.wait (%p60_p5), [#allocation4], 16  }
  0x27   : > { %792 = vsyncadd (%p60_p5), [#allocation4], 4294967280  ;;  %s198_s6 = sand.u32 1, %s803_s16  }
  0x28   : > { %s614_s7 = sshll.u32 %s198_s6, 8  ;;  %s199_s8 = scalar_lea.sflag [#allocation3], %s198_s6 }
  0x29   : > { %s912_s9 = scalar_lea.vmem [#allocation5], %s614_s7 }
  0x2a   : > { %794 = dma.done.wait (%p872_p8), %s199_s8, 4096  }
  0x2b   : > { %796 = vsyncadd (%p872_p8), %s199_s8, 4294963200 }
  0x2c   : > { %208 = sfence }
  0x2d   : > { %s232_s25 = sld [smem:[#allocation2]]  ;;  %v262_v0 = vld [vmem:[%s912_s9 + $0x8] sm:$0xff]  ;;  %v638_v1 = vld [vmem:[%s912_s9 + $0x18] sm:$0xff]  ;;  %v261_v2 = vld [vmem:[%s912_s9] sm:$0xff]  ;;  %vm386_vm0 = vcmask 130048   ;;  %p228_p5 = scmp.lt.s32.totalorder %s857_s19, 1 }
  0x2e   : > { %s616_s30 = sld [smem:[#allocation2 + $0x1]]  ;;  %v637_v3 = vld [vmem:[%s912_s9 + $0x10] sm:$0xff]  ;;  %v640_v5 = vld [vmem:[%s912_s9 + $0x28] sm:$0xff]  ;;  %v639_v6 = vld [vmem:[%s912_s9 + $0x20] sm:$0xff]  ;;  %vm526_vm1 = vcmask 55296  }
  0x2f   : > { %s617_s10 = sld [smem:[#allocation2 + $0x2]]  ;;  %v642_v9 = vld [vmem:[%s912_s9 + $0x38] sm:$0xff]  ;;  %v644_v13 = vld [vmem:[%s912_s9 + $0x48] sm:$0xff]  ;;  %v641_v15 = vld [vmem:[%s912_s9 + $0x30] sm:$0xff]  ;;  %s1053_s19 = smov (!%p228_p5, %s857_s19), 1 }
  0x30   : > { %s918_s11 = sld [smem:[#allocation2 + $0x3]]  ;;  %v643_v19 = vld [vmem:[%s912_s9 + $0x40] sm:$0xff]  ;;  %v646_v25 = vld [vmem:[%s912_s9 + $0x58] sm:$0xff]  ;;  %v645_v28 = vld [vmem:[%s912_s9 + $0x50] sm:$0xff] }
  0x31   : > { %s920_s12 = sld [smem:[#allocation2 + $0x4]]  ;;  %v648_v30 = vld [vmem:[%s912_s9 + $0x68] sm:$0xff]  ;;  %v647_v34 = vld [vmem:[%s912_s9 + $0x60] sm:$0xff]  ;;  %v650_v40 = vld [vmem:[%s912_s9 + $0x78] sm:$0xff] }
  0x32   : > { %s923_s13 = sld [smem:[#allocation2 + $0x5]]  ;;  %v649_v42 = vld [vmem:[%s912_s9 + $0x70] sm:$0xff]  ;;  %v652_v44 = vld [vmem:[%s912_s9 + $0x88] sm:$0xff]  ;;  %v651_v48 = vld [vmem:[%s912_s9 + $0x80] sm:$0xff] }
  0x33   : > { %s928_s24 = sld [smem:[#allocation2 + $0x6]]  ;;  %v263_v4 = vstv %s232_s25  ;;  %v654_v51 = vld [vmem:[%s912_s9 + $0x98] sm:$0xff]  ;;  %v653_v56 = vld [vmem:[%s912_s9 + $0x90] sm:$0xff]  ;;  %v254_v58 = vld [vmem:[%s1043_s3 + $0x8] sm:$0xff] }
  0x34   : > { %s932_s14 = sld [smem:[#allocation2 + $0x7]]  ;;  %v265_v7 = vmul.f32 %v263_v4, %v262_v0  ;;  %v269_v8 = vstv %s616_s30  ;;  %v264_v10 = vmul.f32 %v263_v4, %v261_v2  ;;  %v634_v57 = vld [vmem:[%s1043_s3 + $0x18] sm:$0xff]  ;;  %473 = vmatpush.msra.mxu3 %v254_v58  ;;  %v656_v62 = vld [vmem:[%s912_s9 + $0xa8] sm:$0xff]  ;;  %v655_v0 = vld [vmem:[%s912_s9 + $0xa0] sm:$0xff] }
  0x35   : > { %s935_s15 = sld [smem:[#allocation2 + $0x8]]  ;;  %v271_v11 = vmul.f32 %v638_v1, %v269_v8  ;;  %v277_v12 = vstv %s617_s10  ;;  %v270_v14 = vmul.f32 %v637_v3, %v269_v8  ;;  %450 = vmatpush.msra.mxu2 %v634_v57 }
  0x36   : > { %v279_v16 = vmul.f32 %v640_v5, %v277_v12  ;;  %v285_v17 = vstv %s918_s11  ;;  %v278_v18 = vmul.f32 %v639_v6, %v277_v12  ;;  %s942_s21 = sld [smem:[#allocation2 + $0x9]]  ;;  %v658_v5 = vld [vmem:[%s912_s9 + $0xb8] sm:$0xff]  ;;  %v660_v12 = vld [vmem:[%s912_s9 + $0xc8] sm:$0xff] }
  0x37   : > { %v273_v20 = vadd.f32 %v271_v11, %v265_v7  ;;  %v287_v21 = vmul.f32 %v642_v9, %v285_v17  ;;  %v293_v22 = vstv %s920_s12  ;;  %v272_v23 = vadd.f32 %v270_v14, %v264_v10  ;;  %s949_s22 = sld [smem:[#allocation2 + $0xa]]  ;;  %v657_v7 = vld [vmem:[%s912_s9 + $0xb0] sm:$0xff]  ;;  %v659_v14 = vld [vmem:[%s912_s9 + $0xc0] sm:$0xff] }
  0x38   : > { %v295_v24 = vmul.f32 %v644_v13, %v293_v22  ;;  %v301_v26 = vstv %s923_s13  ;;  %v286_v27 = vmul.f32 %v641_v15, %v285_v17  ;;  %v294_v33 = vmul.f32 %v643_v19, %v293_v22  ;;  %s952_s18 = sld [smem:[#allocation2 + $0xb]]  ;;  %v662_v19 = vld [vmem:[%s912_s9 + $0xd8] sm:$0xff] }
  0x39   : > { %v281_v29 = vadd.f32 %v279_v16, %v273_v20  ;;  %v309_v31 = vstv %s928_s24  ;;  %v280_v32 = vadd.f32 %v278_v18, %v272_v23  ;;  %v303_v36 = vmul.f32 %v646_v25, %v301_v26  ;;  %s959_s26 = sld [smem:[#allocation2 + $0xc]] }
  0x3a   : > { %v302_v38 = vmul.f32 %v645_v28, %v301_v26  ;;  %v311_v39 = vmul.f32 %v648_v30, %v309_v31  ;;  %v317_v41 = vstv %s932_s14  ;;  %v310_v47 = vmul.f32 %v647_v34, %v309_v31  ;;  %s963_s27 = sld [smem:[#allocation2 + $0xd]]  ;;  %v664_v26 = vld [vmem:[%s912_s9 + $0xe8] sm:$0xff]  ;;  %v663_v28 = vld [vmem:[%s912_s9 + $0xe0] sm:$0xff] }
  0x3b   : > { %v289_v35 = vadd.f32 %v287_v21, %v281_v29  ;;  %v288_v37 = vadd.f32 %v286_v27, %v280_v32  ;;  %v325_v45 = vstv %s935_s15  ;;  %v319_v50 = vmul.f32 %v650_v40, %v317_v41  ;;  %s973_s7 = sld [smem:[#allocation2 + $0xe]]  ;;  %v661_v21 = vld [vmem:[%s912_s9 + $0xd0] sm:$0xff] }
  0x3c   : > { %v318_v53 = vmul.f32 %v649_v42, %v317_v41  ;;  %v327_v54 = vmul.f32 %v652_v44, %v325_v45  ;;  %v333_v55 = vstv %s942_s21  ;;  %v326_v61 = vmul.f32 %v651_v48, %v325_v45  ;;  %s978_s8 = sld [smem:[#allocation2 + $0xf]]  ;;  %v248_v48 = vld [vmem:[%s1042_s2] sm:$0x7f] }
  0x3d   : > { %v297_v43 = vadd.f32 %v295_v24, %v289_v35  ;;  %v296_v46 = vadd.f32 %v294_v33, %v288_v37  ;;  %v341_v63 = vstv %s949_s22  ;;  %v335_v2 = vmul.f32 %v654_v51, %v333_v55  ;;  %v666_v33 = vld [vmem:[%s912_s9 + $0xf8] sm:$0xff]  ;;  %v665_v35 = vld [vmem:[%s912_s9 + $0xf0] sm:$0xff] }
  0x3e   : > { %v334_v4 = vmul.f32 %v653_v56, %v333_v55  ;;  %v349_v6 = vstv %s952_s18  ;;  %v343_v9 = vmul.f32 %v656_v62, %v341_v63  ;;  %v342_v11 = vmul.f32 %v655_v0, %v341_v63  ;;  %v633_v51 = vld [vmem:[%s1043_s3 + $0x10] sm:$0xff] }
  0x3f   : > { %v305_v49 = vadd.f32 %v303_v36, %v297_v43  ;;  %v304_v52 = vadd.f32 %v302_v38, %v296_v46  ;;  %v357_v13 = vstv %s959_s26  ;;  %v351_v16 = vmul.f32 %v658_v5, %v349_v6  ;;  %451 = vmatpush.msra.mxu2 %v633_v51 }
  0x40   : > { %v350_v18 = vmul.f32 %v657_v7, %v349_v6  ;;  %v365_v20 = vstv %s963_s27  ;;  %v359_v23 = vmul.f32 %v660_v12, %v357_v13  ;;  %v358_v25 = vmul.f32 %v659_v14, %v357_v13  ;;  %s615_s27 = sshll.u32 %s1053_s19, 3 }
  0x41   : > { %v313_v59 = vadd.f32 %v311_v39, %v305_v49  ;;  %v312_v60 = vadd.f32 %v310_v47, %v304_v52  ;;  %v373_v27 = vstv %s973_s7  ;;  %v367_v30 = vmul.f32 %v662_v19, %v365_v20  ;;  %v631_v49 = vld [vmem:[%s1042_s2 + $0x8] sm:$0x7f]  ;;  %v253_v52 = vld [vmem:[%s1043_s3] sm:$0xff]  ;;  %s231_s5 = scalar_lea.vmem %s1044_s4, %s615_s27 }
  0x42   : > { %v366_v32 = vmul.f32 %v661_v21, %v365_v20  ;;  %v381_v34 = vstv %s978_s8  ;;  %v375_v37 = vmul.f32 %v664_v26, %v373_v27  ;;  %v374_v39 = vmul.f32 %v663_v28, %v373_v27  ;;  %474 = vmatpush.msra.mxu3 %v253_v52 }
  0x43   : > { %v321_v1 = vadd.f32 %v319_v50, %v313_v59  ;;  %v320_v3 = vadd.f32 %v318_v53, %v312_v60  ;;  %v383_v41 = vmul.f32 %v666_v33, %v381_v34  ;;  %v382_v43 = vmul.f32 %v665_v35, %v381_v34  ;;  %v632_v50 = vld [vmem:[%s1042_s2 + $0x10] sm:$0x7f]  ;;  %v636_v53 = vld [vmem:[%s1043_s3 + $0x28] sm:$0xff] }
  0x45   : > { %v329_v8 = vadd.f32 %v327_v54, %v321_v1  ;;  %v328_v10 = vadd.f32 %v326_v61, %v320_v3  ;;  %v635_v54 = vld [vmem:[%s1043_s3 + $0x20] sm:$0xff] }
  0x47   : > { %v337_v15 = vadd.f32 %v335_v2, %v329_v8  ;;  %v336_v17 = vadd.f32 %v334_v4, %v328_v10 }
  0x49   : > { %v345_v22 = vadd.f32 %v343_v9, %v337_v15  ;;  %v344_v24 = vadd.f32 %v342_v11, %v336_v17 }
  0x4b   : > { %v353_v29 = vadd.f32 %v351_v16, %v345_v22  ;;  %v352_v31 = vadd.f32 %v350_v18, %v344_v24 }
  0x4d   : > { %v361_v36 = vadd.f32 %v359_v23, %v353_v29  ;;  %v360_v38 = vadd.f32 %v358_v25, %v352_v31 }
  0x4f   : > { %v369_v40 = vadd.f32 %v367_v30, %v361_v36  ;;  %v368_v42 = vadd.f32 %v366_v32, %v360_v38 }
  0x51   : > { %v377_v44 = vadd.f32 %v375_v37, %v369_v40  ;;  %v376_v45 = vadd.f32 %v374_v39, %v368_v42 }
  0x53   : > { %v385_v46 = vadd.f32 %v383_v41, %v377_v44  ;;  %v384_v47 = vadd.f32 %v382_v43, %v376_v45 }
  0x55   : > { %404 = vmatpush.msra.mxu0 %v385_v46  ;;  %427 = vmatpush.msra.mxu1 %v385_v46 }
  0x57   : > { %405 = vmatpush.msra.mxu0 %v384_v47  ;;  %428 = vmatpush.msra.mxu1 %v384_v47 }
  0x58   : > { %667 = vmatmul.msk.f32.vlgmr.msra.gmra.mxu0 %vm386_vm0, %v248_v48  ;;  %668 = vmatmul.msk.f32.vlgmr.msra.gmra.mxu1 %vm386_vm0, %v631_v49 }
  0x59   : > { %496 = vmatpush.msrb.mxu0 %v385_v46  ;;  %519 = vmatpush.msrb.mxu1 %v636_v53 }
  0x5b   : > { %497 = vmatpush.msrb.mxu0 %v384_v47  ;;  %520 = vmatpush.msrb.mxu1 %v635_v54 }
  0x60   : > { %671 = vmatmul.msk.f32.vlgmr.msrb.gmra.mxu0 %vm386_vm0, %v632_v50 }
  0xd5   : > { %v407_v55 = vpop.f32.mrf.mxu0  ;;  %v430_v56 = vpop.f32.mrf.mxu1 }
  0xd6   : > { %669 = vmatmul.msk.f32.vlgmr.msra.gmra.mxu2 %vm386_vm0, %v430_v56  ;;  %670 = vmatmul.msk.f32.vlgmr.msra.gmra.mxu3 %vm386_vm0, %v407_v55 }
  0xdd   : > { %v499_v57 = vpop.f32.mrf.mxu0 }
  0xde   : > { %672 = vmatmul.msk.f32.vlgmr.msrb.gmra.mxu1 %vm386_vm0, %v499_v57 }
 0x159   : > { %v453_v58 = vpop.f32.mrf.mxu2  ;;  %v476_v59 = vpop.f32.mrf.mxu3 }
 0x15a   : > { %v477_v60 = vadd.f32 %v476_v59, %v453_v58 }
 0x15b   : > { %v522_v61 = vpop.f32.mrf.mxu1 }
 0x15c   : > { %v525_v62 = vadd.f32 %v522_v61, %v477_v60 }
 0x15e   : > { %527 = vst.msk [vmem:[%s231_s5] sm:$0x7f] %vm526_vm1, %v525_v62 }
 0x15f PF: > { %p15_p8 = scmp.ge.s32.totalorder %s859_s20, 4   ;;  %s1048_s15 = smov %s803_s16 }
 0x160   : > { %s1049_s16 = smov %s807_s17  ;;  %s1050_s17 = smov %s867_s23 }
 0x161   : > { %s1051_s18 = smov %s859_s20  ;;  %17 = sbr.rel (!%p15_p8) target bundleno = 4 (0x4), region = 100 }
 0x166   :  { %547 = vsyncpa [#allocation3], 1 }
 0x167   :  { %549 = vsyncpa [#allocation3 + $0x1], 1 }
 0x168   :  { %550 = vsyncpa [#allocation4], 1 }
 0x169   :  { %552 = vsyncpa [#allocation4 + $0x1], 1 }

// kernel: tpu_custom_call.1
= control target key start
LH: loop header
LB: loop body
LE: loop exit
PB: predicated region body
PF: predicated region fallthrough
CT: control target
= control target key end

     0   :  { %s1869_s0 = inlined_call_operand.vmem [shape: f32[144], index: 0, kind: input, shape index: {}]   ;;  %s1870_s1 = inlined_call_operand.vmem [shape: f32[2,64,8,8], index: 1, kind: input, shape index: {}]   ;;  %s1871_s2 = inlined_call_operand.vmem [shape: f32[2,7,7], index: 2, kind: output, shape index: {}]  }
   0x1   :  { %1873 = sst [smem:[#allocation6_spill]] %s1869_s0 }
   0x2   :  { %1874 = sst [smem:[#allocation7_spill]] %s1870_s1 }
   0x3   :  { %1875 = sst [smem:[#allocation8_spill]] %s1871_s2 }
   0x4   :  { %7 = vsyncpa [#allocation3], 0  ;;  %s1227_s9 = smov 0  }
   0x5 LB: > { %1876 = sst [smem:[#allocation5_spill]] %s1208_s9  ;;  %s944_s10 = sadd.s32 4294967295, %s1208_s9   ;;  %s1208_s9 = sphi %s1227_s9, %s13_s9  }
   0x6   : > { %p946_p0 = scmp.ge.s32.totalorder %s1208_s9, 1  ;;  %p91_p1 = scmp.lt.s32.totalorder %s1208_s9, 3 }
   0x7   : > { %s1877_s0 = sld [smem:[#allocation6_spill]]  ;;  %p1171_p3 = scmp.eq.s32.totalorder %s944_s10, 0 }
   0x8   : > { %p92_p2 = pnand %p946_p0, %p91_p1  ;;  %s1210_s14 = smov [#allocation2]  }
   0xa   : > { %p1167_p4 = pneg %p92_p2  ;;  %124 = sbr.rel (%p92_p2) target bundleno = 211 (0xd3), region = 28 }
   0xc   : > { %p1168_p5 = pnand %p1171_p3, %p1167_p4 }
   0xd   : > { %s103_s13 = sshll.u32 %s1877_s0, 4  ;;  %s104_s13 = int_to_ptr.vmem [resolvable:$true] %s103_s13 }
   0xe   : > { %1170 = dma.vmem_to_smem (!%p1168_p5), %s104_s13, 32, %s1210_s14, [#allocation3]  }
   0xf   : > { %1203 = dma.done.wait (%p1171_p3), [#allocation3], 32  }
  0x10   : > { %1205 = vsyncadd (%p1171_p3), [#allocation3], 4294967264 }
  0x11   : > { %131 = sfence }
  0x12   : > { %p147_p6 = scmp.lt.s32.totalorder %s944_s10, 1  ;;  %s954_s15 = sld [smem:[#allocation2 + $0x20]]  ;;  %vm877_vm0 = vcmask 55296  }
  0x13   : > { %s959_s16 = sld [smem:[#allocation2 + $0x21]] }
  0x14   : > { %s1882_s10 = smov (!%p147_p6, %s944_s10), 1  ;;  %s964_s17 = sld [smem:[#allocation2 + $0x22]] }
  0x15   : > { %s1162_s18 = sshll.u32 %s1882_s10, 9  ;;  %s969_s19 = sld [smem:[#allocation2 + $0x23]] }
  0x16   : > { %s1878_s1 = sld [smem:[#allocation7_spill]] }
  0x17   : > { %s974_s23 = sld [smem:[#allocation2 + $0x24]] }
  0x18   : > { %v161_v1 = vstv %s954_s15  ;;  %s979_s24 = sld [smem:[#allocation2 + $0x25]] }
  0x19   : > { %v176_v4 = vstv %s959_s16  ;;  %s984_s25 = sld [smem:[#allocation2 + $0x26]] }
  0x1a   : > { %s1260_s26 = sld [smem:[#allocation2 + $0x27]]  ;;  %v194_v8 = vstv %s964_s17 }
  0x1b   : > { %s1265_s27 = sld [smem:[#allocation2 + $0x28]]  ;;  %v212_v12 = vstv %s969_s19 }
  0x1c   : > { %s1244_s22 = scalar_lea.vmem %s1878_s1, %s1162_s18  ;;  %s1268_s28 = sld [smem:[#allocation2 + $0x29]] }
  0x1d   : > { %v1247_v0 = vld [vmem:[%s1244_s22] sm:$0xff]  ;;  %v1250_v2 = vld [vmem:[%s1244_s22 + $0x8] sm:$0xff]  ;;  %v1254_v5 = vld [vmem:[%s1244_s22 + $0x10] sm:$0xff]  ;;  %v230_v14 = vstv %s974_s23  ;;  %s1274_s29 = sld [smem:[#allocation2 + $0x2a]] }
  0x1e   : > { %v162_v3 = vmul.f32 %v161_v1, %v1247_v0  ;;  %v177_v6 = vmul.f32 %v1250_v2, %v176_v4  ;;  %v1258_v7 = vld [vmem:[%s1244_s22 + $0x18] sm:$0xff]  ;;  %v1263_v9 = vld [vmem:[%s1244_s22 + $0x20] sm:$0xff]  ;;  %v195_v11 = vmul.f32 %v1254_v5, %v194_v8  ;;  %v1272_v15 = vld [vmem:[%s1244_s22 + $0x28] sm:$0xff]  ;;  %v248_v18 = vstv %s979_s24  ;;  %s1277_s30 = sld [smem:[#allocation2 + $0x2b]] }
  0x1f   : > { %v213_v13 = vmul.f32 %v1258_v7, %v212_v12  ;;  %v231_v17 = vmul.f32 %v1263_v9, %v230_v14  ;;  %v1280_v19 = vld [vmem:[%s1244_s22 + $0x30] sm:$0xff]  ;;  %v266_v20 = vstv %s984_s25  ;;  %s1282_s3 = sld [smem:[#allocation2 + $0x2c]]  ;;  %v249_v22 = vmul.f32 %v1272_v15, %v248_v18  ;;  %v1288_v23 = vld [vmem:[%s1244_s22 + $0x38] sm:$0xff]  ;;  %v1297_v27 = vld [vmem:[%s1244_s22 + $0x40] sm:$0xff] }
  0x20   : > { %v178_v10 = vadd.f32 %v177_v6, %v162_v3  ;;  %s1285_s4 = sld [smem:[#allocation2 + $0x2d]]  ;;  %v284_v24 = vstv %s1260_s26  ;;  %v267_v26 = vmul.f32 %v1280_v19, %v266_v20  ;;  %v1302_v31 = vld [vmem:[%s1244_s22 + $0x48] sm:$0xff]  ;;  %v1307_v35 = vld [vmem:[%s1244_s22 + $0x50] sm:$0xff]  ;;  %v1316_v39 = vld [vmem:[%s1244_s22 + $0x58] sm:$0xff] }
  0x21   : > { %s1291_s5 = sld [smem:[#allocation2 + $0x2e]]  ;;  %v302_v28 = vstv %s1265_s27  ;;  %v285_v30 = vmul.f32 %v1288_v23, %v284_v24  ;;  %v1326_v46 = vld [vmem:[%s1244_s22 + $0x60] sm:$0xff]  ;;  %v1337_v54 = vld [vmem:[%s1244_s22 + $0x68] sm:$0xff]  ;;  %v1349_v62 = vld [vmem:[%s1244_s22 + $0x70] sm:$0xff] }
  0x22   : > { %v196_v16 = vadd.f32 %v195_v11, %v178_v10  ;;  %s1294_s6 = sld [smem:[#allocation2 + $0x2f]]  ;;  %v320_v32 = vstv %s1268_s28  ;;  %v303_v34 = vmul.f32 %v1297_v27, %v302_v28  ;;  %v1360_v10 = vld [vmem:[%s1244_s22 + $0x78] sm:$0xff] }
  0x23   : > { %s956_s7 = sld [smem:[#allocation2 + $0x80]]  ;;  %v338_v36 = vstv %s1274_s29  ;;  %v321_v38 = vmul.f32 %v1302_v31, %v320_v32 }
  0x24   : > { %v214_v21 = vadd.f32 %v213_v13, %v196_v16  ;;  %s961_s8 = sld [smem:[#allocation2 + $0x81]]  ;;  %v356_v40 = vstv %s1277_s30  ;;  %v339_v43 = vmul.f32 %v1307_v35, %v338_v36 }
  0x25   : > { %s966_s11 = sld [smem:[#allocation2 + $0x82]]  ;;  %v374_v47 = vstv %s1282_s3  ;;  %v357_v51 = vmul.f32 %v1316_v39, %v356_v40 }
  0x26   : > { %v232_v25 = vadd.f32 %v231_v17, %v214_v21  ;;  %s971_s12 = sld [smem:[#allocation2 + $0x83]]  ;;  %v392_v55 = vstv %s1285_s4  ;;  %v375_v60 = vmul.f32 %v1326_v46, %v374_v47  ;;  %v1401_v47 = vld [vmem:[%s1244_s22 + $0x118] sm:$0xff] }
  0x27   : > { %s1310_s13 = sld [smem:[#allocation2 + $0x84]]  ;;  %v410_v63 = vstv %s1291_s5  ;;  %v393_v6 = vmul.f32 %v1337_v54, %v392_v55  ;;  %s1211_s5 = smov 127  }
  0x28   : > { %v250_v29 = vadd.f32 %v249_v22, %v232_v25  ;;  %s1313_s14 = sld [smem:[#allocation2 + $0x85]]  ;;  %v428_v11 = vstv %s1294_s6  ;;  %v411_v16 = vmul.f32 %v1349_v62, %v410_v63 }
  0x29   : > { %v167_v41 = vstv %s956_s7  ;;  %s1319_s15 = sld [smem:[#allocation2 + $0x86]]  ;;  %v429_v22 = vmul.f32 %v1360_v10, %v428_v11 }
  0x2a   : > { %v268_v33 = vadd.f32 %v267_v26, %v250_v29  ;;  %v168_v44 = vmul.f32 %v167_v41, %v1247_v0  ;;  %v184_v45 = vstv %s961_s8  ;;  %s1323_s16 = sld [smem:[#allocation2 + $0x87]] }
  0x2b   : > { %v185_v48 = vmul.f32 %v1250_v2, %v184_v45  ;;  %v202_v49 = vstv %s966_s11  ;;  %s1330_s17 = sld [smem:[#allocation2 + $0x88]] }
  0x2c   : > { %v286_v37 = vadd.f32 %v285_v30, %v268_v33  ;;  %v203_v52 = vmul.f32 %v1254_v5, %v202_v49  ;;  %v220_v53 = vstv %s971_s12  ;;  %s1334_s18 = sld [smem:[#allocation2 + $0x89]]  ;;  %v1381_v33 = vld [vmem:[%s1244_s22 + $0x100] sm:$0xff] }
  0x2d   : > { %v186_v56 = vadd.f32 %v185_v48, %v168_v44  ;;  %v221_v57 = vmul.f32 %v1258_v7, %v220_v53  ;;  %v238_v58 = vstv %s1310_s13  ;;  %s1342_s19 = sld [smem:[#allocation2 + $0x8a]] }
  0x2e   : > { %v304_v42 = vadd.f32 %v303_v34, %v286_v37  ;;  %v256_v61 = vstv %s1313_s14  ;;  %s1346_s20 = sld [smem:[#allocation2 + $0x8b]]  ;;  %v239_v3 = vmul.f32 %v1263_v9, %v238_v58  ;;  %v1387_v37 = vld [vmem:[%s1244_s22 + $0x108] sm:$0xff] }
  0x2f   : > { %v204_v1 = vadd.f32 %v203_v52, %v186_v56  ;;  %s1353_s21 = sld [smem:[#allocation2 + $0x8c]]  ;;  %v274_v8 = vstv %s1319_s15  ;;  %v257_v13 = vmul.f32 %v1272_v15, %v256_v61 }
  0x30   : > { %v322_v50 = vadd.f32 %v321_v38, %v304_v42  ;;  %s1357_s23 = sld [smem:[#allocation2 + $0x8d]]  ;;  %v292_v17 = vstv %s1323_s16  ;;  %v275_v20 = vmul.f32 %v1280_v19, %v274_v8 }
  0x31   : > { %v222_v12 = vadd.f32 %v221_v57, %v204_v1  ;;  %s1364_s24 = sld [smem:[#allocation2 + $0x8e]]  ;;  %v310_v24 = vstv %s1330_s17  ;;  %v293_v26 = vmul.f32 %v1288_v23, %v292_v17  ;;  %v1413_v57 = vld [vmem:[%s1244_s22 + $0x120] sm:$0xff]  ;;  %v1421_v1 = vld [vmem:[%s1244_s22 + $0x128] sm:$0xff] }
  0x32   : > { %v340_v59 = vadd.f32 %v339_v43, %v322_v50  ;;  %s1368_s25 = sld [smem:[#allocation2 + $0x8f]]  ;;  %v328_v29 = vstv %s1334_s18  ;;  %v311_v32 = vmul.f32 %v1297_v27, %v310_v24  ;;  %v1394_v43 = vld [vmem:[%s1244_s22 + $0x110] sm:$0xff] }
  0x33   : > { %v240_v18 = vadd.f32 %v239_v3, %v222_v12  ;;  %s1082_s26 = sld [smem:[#allocation2 + $0x50]]  ;;  %v346_v36 = vstv %s1342_s19  ;;  %v329_v40 = vmul.f32 %v1302_v31, %v328_v29 }
  0x34   : > { %v358_v4 = vadd.f32 %v357_v51, %v340_v59  ;;  %s1085_s27 = sld [smem:[#allocation2 + $0x51]]  ;;  %v364_v41 = vstv %s1346_s20  ;;  %v347_v49 = vmul.f32 %v1307_v35, %v346_v36 }
  0x35   : > { %v258_v25 = vadd.f32 %v257_v13, %v240_v18  ;;  %s1374_s28 = sld [smem:[#allocation2 + $0x52]]  ;;  %v365_v52 = vmul.f32 %v1316_v39, %v364_v41  ;;  %v382_v53 = vstv %s1353_s21  ;;  %v1430_v13 = vld [vmem:[%s1244_s22 + $0x130] sm:$0xff]  ;;  %v1455_v41 = vld [vmem:[%s1244_s22 + $0x148] sm:$0xff] }
  0x36   : > { %v376_v14 = vadd.f32 %v375_v60, %v358_v4  ;;  %s1377_s29 = sld [smem:[#allocation2 + $0x53]]  ;;  %v400_v63 = vstv %s1357_s23 }
  0x37   : > { %v276_v30 = vadd.f32 %v275_v20, %v258_v25  ;;  %s1383_s30 = sld [smem:[#allocation2 + $0x54]]  ;;  %v418_v12 = vstv %s1364_s24  ;;  %v401_v17 = vmul.f32 %v1337_v54, %v400_v63 }
  0x38   : > { %v394_v21 = vadd.f32 %v393_v6, %v376_v14  ;;  %s1389_s3 = sld [smem:[#allocation2 + $0x55]]  ;;  %v383_v6 = vmul.f32 %v1326_v46, %v382_v53 }
  0x39   : > { %v294_v38 = vadd.f32 %v293_v26, %v276_v30  ;;  %v623_v42 = vstv %s1082_s26  ;;  %s1396_s4 = sld [smem:[#allocation2 + $0x56]]  ;;  %v419_v26 = vmul.f32 %v1349_v62, %v418_v12  ;;  %v1447_v30 = vld [vmem:[%s1244_s22 + $0x140] sm:$0xff] }
  0x3a   : > { %v412_v28 = vadd.f32 %v411_v16, %v394_v21  ;;  %v624_v44 = vmul.f32 %v1381_v33, %v623_v42  ;;  %v632_v45 = vstv %s1085_s27  ;;  %s1403_s6 = sld [smem:[#allocation2 + $0x57]]  ;;  %v436_v21 = vstv %s1368_s25 }
  0x3b   : > { %v312_v48 = vadd.f32 %v311_v32, %v294_v38  ;;  %v633_v50 = vmul.f32 %v1387_v37, %v632_v45  ;;  %v642_v51 = vstv %s1374_s28  ;;  %s1415_s7 = sld [smem:[#allocation2 + $0x58]]  ;;  %v437_v36 = vmul.f32 %v1360_v10, %v436_v21 }
  0x3c   : > { %v430_v34 = vadd.f32 %v429_v22, %v412_v28  ;;  %v643_v55 = vmul.f32 %v1394_v43, %v642_v51  ;;  %v652_v56 = vstv %s1377_s29  ;;  %s1424_s8 = sld [smem:[#allocation2 + $0x59]]  ;;  %v1439_v22 = vld [vmem:[%s1244_s22 + $0x138] sm:$0xff] }
  0x3d   : > { %v330_v58 = vadd.f32 %v329_v40, %v312_v48  ;;  %v634_v59 = vadd.f32 %v633_v50, %v624_v44  ;;  %v653_v60 = vmul.f32 %v1401_v47, %v652_v56  ;;  %v662_v61 = vstv %s1383_s30  ;;  %s1433_s11 = sld [smem:[#allocation2 + $0x5a]] }
  0x3e   : > { %440 = vrot.lane.b32.xlu0 %v430_v34, %s1211_s5  ;;  %v672_v3 = vstv %s1389_s3  ;;  %v663_v11 = vmul.f32 %v1413_v57, %v662_v61  ;;  %s1442_s12 = sld [smem:[#allocation2 + $0x5b]]  ;;  %v1470_v61 = vld [vmem:[%s1244_s22 + $0x160] sm:$0xff] }
  0x3f   : > { %v348_v4 = vadd.f32 %v347_v49, %v330_v58  ;;  %v644_v8 = vadd.f32 %v643_v55, %v634_v59  ;;  %v682_v14 = vstv %s1396_s4  ;;  %v673_v20 = vmul.f32 %v1421_v1, %v672_v3  ;;  %s1450_s13 = sld [smem:[#allocation2 + $0x5c]]  ;;  %v1460_v49 = vld [vmem:[%s1244_s22 + $0x150] sm:$0xff]  ;;  %v1465_v55 = vld [vmem:[%s1244_s22 + $0x158] sm:$0xff] }
  0x40   : > { %v692_v24 = vstv %s1403_s6  ;;  %v683_v29 = vmul.f32 %v1430_v13, %v682_v14  ;;  %s1121_s14 = sld [smem:[#allocation2 + $0x5d]]  ;;  %v1480_v14 = vld [vmem:[%s1244_s22 + $0x170] sm:$0xff] }
  0x41   : > { %v366_v16 = vadd.f32 %v365_v52, %v348_v4  ;;  %v654_v18 = vadd.f32 %v653_v60, %v644_v8  ;;  %v702_v32 = vstv %s1415_s7  ;;  %v693_v40 = vmul.f32 %v1439_v22, %v692_v24  ;;  %s1124_s15 = sld [smem:[#allocation2 + $0x5e]] }
  0x42   : > { %v712_v42 = vstv %s1424_s8  ;;  %v703_v48 = vmul.f32 %v1447_v30, %v702_v32  ;;  %s1127_s16 = sld [smem:[#allocation2 + $0x5f]] }
  0x43   : > { %v384_v25 = vadd.f32 %v383_v6, %v366_v16  ;;  %v664_v28 = vadd.f32 %v663_v11, %v654_v18  ;;  %v722_v50 = vstv %s1433_s11  ;;  %v713_v53 = vmul.f32 %v1455_v41, %v712_v42  ;;  %v1476_v6 = vld [vmem:[%s1244_s22 + $0x168] sm:$0xff]  ;;  %s1489_s17 = sld [smem:[#allocation2]] }
  0x44   : > { %v732_v56 = vstv %s1442_s12  ;;  %v723_v60 = vmul.f32 %v1460_v49, %v722_v50  ;;  %s1491_s18 = sld [smem:[#allocation2 + $0x60]] }
  0x45   : > { %v402_v34 = vadd.f32 %v401_v17, %v384_v25  ;;  %v674_v38 = vadd.f32 %v673_v20, %v664_v28  ;;  %v742_v63 = vstv %s1450_s13  ;;  %v733_v4 = vmul.f32 %v1465_v55, %v732_v56  ;;  %v1484_v20 = vld [vmem:[%s1244_s22 + $0x178] sm:$0xff]  ;;  %s1493_s19 = sld [smem:[#allocation2 + $0x1]] }
  0x46   : > { %v752_v8 = vstv %s1121_s14  ;;  %v743_v12 = vmul.f32 %v1470_v61, %v742_v63  ;;  %s1495_s20 = sld [smem:[#allocation2 + $0x61]] }
  0x47   : > { %v420_v44 = vadd.f32 %v419_v26, %v402_v34  ;;  %v684_v45 = vadd.f32 %v683_v29, %v674_v38  ;;  %v762_v16 = vstv %s1124_s15  ;;  %v753_v18 = vmul.f32 %v1476_v6, %v752_v8  ;;  %s1497_s21 = sld [smem:[#allocation2 + $0x2]] }
  0x48   : > { %v772_v21 = vstv %s1127_s16  ;;  %v763_v25 = vmul.f32 %v1480_v14, %v762_v16  ;;  %s1499_s23 = sld [smem:[#allocation2 + $0x62]] }
  0x49   : > { %v438_v51 = vadd.f32 %v437_v36, %v420_v44  ;;  %v694_v52 = vadd.f32 %v693_v40, %v684_v45  ;;  %v773_v28 = vmul.f32 %v1484_v20, %v772_v21  ;;  %s1501_s24 = sld [smem:[#allocation2 + $0x3]]  ;;  %v158_v34 = vstv %s1489_s17 }
  0x4a   : > { %s1503_s25 = sld [smem:[#allocation2 + $0x63]]  ;;  %v164_v36 = vstv %s1491_s18  ;;  %v159_v42 = vmul.f32 %v158_v34, %v1247_v0 }
  0x4b   : > { %v449_v58 = vrot.slane %v438_v51, 1  ;;  %v704_v59 = vadd.f32 %v703_v48, %v694_v52  ;;  %s1505_s26 = sld [smem:[#allocation2 + $0x4]]  ;;  %v172_v38 = vstv %s1493_s19  ;;  %v165_v44 = vmul.f32 %v164_v36, %v1247_v0 }
  0x4c   : > { %s1507_s27 = sld [smem:[#allocation2 + $0x64]]  ;;  %v180_v40 = vstv %s1495_s20  ;;  %v173_v45 = vmul.f32 %v1250_v2, %v172_v38 }
  0x4d   : > { %450 = vrot.lane.b32.xlu0 %v449_v58, %s1211_s5  ;;  %v714_v3 = vadd.f32 %v713_v53, %v704_v59  ;;  %s1509_s28 = sld [smem:[#allocation2 + $0x5]]  ;;  %v181_v48 = vmul.f32 %v1250_v2, %v180_v40  ;;  %v190_v50 = vstv %s1497_s21 }
  0x4e   : > { %s1511_s29 = sld [smem:[#allocation2 + $0x65]]  ;;  %v198_v51 = vstv %s1499_s23  ;;  %v174_v52 = vadd.f32 %v173_v45, %v159_v42  ;;  %v191_v56 = vmul.f32 %v1254_v5, %v190_v50 }
  0x4f   : > { %v724_v11 = vadd.f32 %v723_v60, %v714_v3  ;;  %s1513_s30 = sld [smem:[#allocation2 + $0x6]]  ;;  %v182_v53 = vadd.f32 %v181_v48, %v165_v44  ;;  %v199_v58 = vmul.f32 %v1254_v5, %v198_v51  ;;  %v208_v0 = vstv %s1501_s24  ;;  %v1032_v48 = vld [vmem:[%s1244_s22 + $0x80] sm:$0xff] }
  0x50   : > { %s1515_s3 = sld [smem:[#allocation2 + $0x66]]  ;;  %v216_v59 = vstv %s1503_s25  ;;  %v192_v2 = vadd.f32 %v191_v56, %v174_v52  ;;  %v209_v63 = vmul.f32 %v1258_v7, %v208_v0 }
  0x51   : > { %v734_v17 = vadd.f32 %v733_v4, %v724_v11  ;;  %s1517_s4 = sld [smem:[#allocation2 + $0x7]]  ;;  %v200_v60 = vadd.f32 %v199_v58, %v182_v53  ;;  %v217_v3 = vmul.f32 %v1258_v7, %v216_v59  ;;  %v226_v4 = vstv %s1505_s26  ;;  %v1035_v59 = vld [vmem:[%s1244_s22 + $0x88] sm:$0xff] }
  0x52   : > { %s1521_s6 = sld [smem:[#allocation2 + $0x8]]  ;;  %v234_v8 = vstv %s1507_s27  ;;  %v210_v5 = vadd.f32 %v209_v63, %v192_v2 }
  0x53   : > { %v744_v24 = vadd.f32 %v743_v12, %v734_v17  ;;  %s1523_s7 = sld [smem:[#allocation2 + $0x68]]  ;;  %v218_v11 = vadd.f32 %v217_v3, %v200_v60  ;;  %v227_v12 = vmul.f32 %v1263_v9, %v226_v4  ;;  %v235_v16 = vmul.f32 %v1263_v9, %v234_v8 }
  0x54   : > { %s1525_s8 = sld [smem:[#allocation2 + $0x9]]  ;;  %v244_v17 = vstv %s1509_s28 }
  0x55   : > { %v754_v26 = vadd.f32 %v753_v18, %v744_v24  ;;  %s1527_s11 = sld [smem:[#allocation2 + $0x69]]  ;;  %v252_v18 = vstv %s1511_s29  ;;  %v228_v7 = vadd.f32 %v227_v12, %v210_v5  ;;  %v236_v21 = vadd.f32 %v235_v16, %v218_v11 }
  0x56   : > { %s1529_s12 = sld [smem:[#allocation2 + $0xa]]  ;;  %v245_v24 = vmul.f32 %v1272_v15, %v244_v17  ;;  %v270_v9 = vstv %s1515_s3 }
  0x57   : > { %v764_v29 = vadd.f32 %v763_v25, %v754_v26  ;;  %s1531_s13 = sld [smem:[#allocation2 + $0x6a]]  ;;  %v253_v25 = vmul.f32 %v1272_v15, %v252_v18  ;;  %v262_v26 = vstv %s1513_s30  ;;  %v271_v34 = vmul.f32 %v1280_v19, %v270_v9 }
  0x58   : > { %s1533_s14 = sld [smem:[#allocation2 + $0xb]]  ;;  %v280_v15 = vstv %s1517_s4 }
  0x59   : > { %v774_v32 = vadd.f32 %v773_v28, %v764_v29  ;;  %s1535_s15 = sld [smem:[#allocation2 + $0x6b]]  ;;  %v246_v28 = vadd.f32 %v245_v24, %v228_v7  ;;  %v254_v29 = vadd.f32 %v253_v25, %v236_v21  ;;  %v281_v44 = vmul.f32 %v1288_v23, %v280_v15  ;;  %v1038_v24 = vld [vmem:[%s1244_s22 + $0x90] sm:$0xff] }
  0x5a   : > { %s1537_s16 = sld [smem:[#allocation2 + $0xc]]  ;;  %v306_v50 = vstv %s1523_s7 }
  0x5b   : > { %777 = vrot.lane.b32.xlu1 %v774_v32, %s1211_s5  ;;  %s1519_s5 = sld [smem:[#allocation2 + $0x67]]  ;;  %v263_v32 = vmul.f32 %v1280_v19, %v262_v26  ;;  %v272_v42 = vadd.f32 %v271_v34, %v254_v29  ;;  %v298_v19 = vstv %s1521_s6  ;;  %v307_v0 = vmul.f32 %v1297_v27, %v306_v50 }
  0x5c   : > { %s1539_s0 = sld [smem:[#allocation2 + $0x6c]]  ;;  %v299_v58 = vmul.f32 %v1297_v27, %v298_v19  ;;  %v324_v2 = vstv %s1527_s11  ;;  %v334_v27 = vstv %s1529_s12 }
  0x5d   : > { %s1541_s1 = sld [smem:[#allocation2 + $0xd]]  ;;  %v264_v40 = vadd.f32 %v263_v32, %v246_v28  ;;  %v325_v5 = vmul.f32 %v1302_v31, %v324_v2  ;;  %v342_v11 = vstv %s1531_s13  ;;  %v335_v7 = vmul.f32 %v1307_v35, %v334_v27 }
  0x5e   : > { %s1547_s9 = sld [smem:[#allocation2 + $0x6d]]  ;;  %v343_v21 = vmul.f32 %v1307_v35, %v342_v11  ;;  %v1050_v11 = vld [vmem:[%s1244_s22 + $0xb0] sm:$0xff] }
  0x5f   : > { %s1553_s2 = sld [smem:[#allocation2 + $0xe]]  ;;  %v282_v53 = vadd.f32 %v281_v44, %v264_v40  ;;  %v360_v25 = vstv %s1535_s15 }
  0x60   : > { %s1557_s17 = sld [smem:[#allocation2 + $0x6e]] }
  0x61   : > { %s1561_s18 = sld [smem:[#allocation2 + $0xf]]  ;;  %v288_v36 = vstv %s1519_s5  ;;  %v300_v3 = vadd.f32 %v299_v58, %v282_v53 }
  0x62   : > { %s1565_s19 = sld [smem:[#allocation2 + $0x10]]  ;;  %v289_v45 = vmul.f32 %v1288_v23, %v288_v36  ;;  %v316_v23 = vstv %s1525_s8  ;;  %v361_v36 = vmul.f32 %v1316_v39, %v360_v25  ;;  %v378_v40 = vstv %s1539_s0 }
  0x63   : > { %s1569_s20 = sld [smem:[#allocation2 + $0x70]]  ;;  %v317_v8 = vmul.f32 %v1302_v31, %v316_v23  ;;  %v352_v31 = vstv %s1533_s14 }
  0x64   : > { %s1573_s21 = sld [smem:[#allocation2 + $0x11]]  ;;  %v290_v56 = vadd.f32 %v289_v45, %v272_v42  ;;  %v353_v15 = vmul.f32 %v1316_v39, %v352_v31  ;;  %v1041_v45 = vld [vmem:[%s1244_s22 + $0x98] sm:$0xff]  ;;  %v396_v23 = vstv %s1547_s9 }
  0x65   : > { %s1577_s23 = sld [smem:[#allocation2 + $0x6f]]  ;;  %v318_v17 = vadd.f32 %v317_v8, %v300_v3  ;;  %v1047_v3 = vld [vmem:[%s1244_s22 + $0xa8] sm:$0xff] }
  0x66   : > { %s1581_s24 = sld [smem:[#allocation2 + $0x71]]  ;;  %v308_v4 = vadd.f32 %v307_v0, %v290_v56  ;;  %v1044_v0 = vld [vmem:[%s1244_s22 + $0xa0] sm:$0xff] }
  0x67   : > { %s1585_s25 = sld [smem:[#allocation2 + $0x12]]  ;;  %v336_v35 = vadd.f32 %v335_v7, %v318_v17  ;;  %v1053_v7 = vld [vmem:[%s1244_s22 + $0xb8] sm:$0xff] }
  0x68   : > { %s1589_s26 = sld [smem:[#allocation2 + $0x72]]  ;;  %v457_v38 = vstv %s1565_s19  ;;  %v326_v18 = vadd.f32 %v325_v5, %v308_v4 }
  0x69   : > { %s1593_s27 = sld [smem:[#allocation2 + $0x13]]  ;;  %v460_v51 = vstv %s1569_s20  ;;  %v458_v60 = vmul.f32 %v1032_v48, %v457_v38  ;;  %v370_v38 = vstv %s1537_s16  ;;  %v354_v39 = vadd.f32 %v353_v15, %v336_v35 }
  0x6a   : > { %s1598_s28 = sld [smem:[#allocation2 + $0x73]]  ;;  %v465_v52 = vstv %s1573_s21  ;;  %v461_v12 = vmul.f32 %v1032_v48, %v460_v51  ;;  %v344_v34 = vadd.f32 %v343_v21, %v326_v18  ;;  %v371_v51 = vmul.f32 %v1326_v46, %v370_v38 }
  0x6b   : > { %s1603_s29 = sld [smem:[#allocation2 + $0x14]]  ;;  %v466_v16 = vmul.f32 %v1035_v59, %v465_v52  ;;  %v379_v52 = vmul.f32 %v1326_v46, %v378_v40 }
  0x6c   : > { %s1609_s30 = sld [smem:[#allocation2 + $0x74]]  ;;  %v469_v63 = vstv %s1581_s24  ;;  %v362_v50 = vadd.f32 %v361_v36, %v344_v34  ;;  %v372_v4 = vadd.f32 %v371_v51, %v354_v39  ;;  %v406_v51 = vstv %s1553_s2 }
  0x6d   : > { %s1614_s3 = sld [smem:[#allocation2 + $0x15]]  ;;  %v470_v26 = vmul.f32 %v1035_v59, %v469_v63  ;;  %v475_v9 = vstv %s1585_s25  ;;  %v467_v28 = vadd.f32 %v466_v16, %v458_v60  ;;  %v388_v59 = vstv %s1541_s1 }
  0x6e   : > { %s1619_s4 = sld [smem:[#allocation2 + $0x75]]  ;;  %v476_v29 = vmul.f32 %v1038_v24, %v475_v9  ;;  %v479_v32 = vstv %s1589_s26  ;;  %v380_v8 = vadd.f32 %v379_v52, %v362_v50  ;;  %v389_v21 = vmul.f32 %v1337_v54, %v388_v59 }
  0x6f   : > { %s1623_s5 = sld [smem:[#allocation2 + $0x16]]  ;;  %v471_v42 = vadd.f32 %v470_v26, %v461_v12  ;;  %v480_v44 = vmul.f32 %v1038_v24, %v479_v32  ;;  %v485_v19 = vstv %s1593_s27  ;;  %v1056_v32 = vld [vmem:[%s1244_s22 + $0xc0] sm:$0xff]  ;;  %v414_v52 = vstv %s1557_s17 }
  0x70   : > { %s1627_s6 = sld [smem:[#allocation2 + $0x76]]  ;;  %v477_v48 = vadd.f32 %v476_v29, %v467_v28  ;;  %v486_v56 = vmul.f32 %v1041_v45, %v485_v19  ;;  %v489_v58 = vstv %s1598_s28 }
  0x71   : > { %s1632_s7 = sld [smem:[#allocation2 + $0x17]]  ;;  %v481_v53 = vadd.f32 %v480_v44, %v471_v42  ;;  %v490_v60 = vmul.f32 %v1041_v45, %v489_v58  ;;  %v495_v46 = vstv %s1603_s29  ;;  %v1059_v45 = vld [vmem:[%s1244_s22 + $0xc8] sm:$0xff] }
  0x72   : > { %s1637_s8 = sld [smem:[#allocation2 + $0x77]]  ;;  %v487_v2 = vadd.f32 %v486_v56, %v477_v48  ;;  %v499_v63 = vstv %s1609_s30  ;;  %v496_v5 = vmul.f32 %v1044_v0, %v495_v46  ;;  %v397_v48 = vmul.f32 %v1337_v54, %v396_v23 }
  0x73   : > { %s1639_s11 = sld [smem:[#allocation2 + $0x18]]  ;;  %v500_v27 = vmul.f32 %v1044_v0, %v499_v63  ;;  %v491_v12 = vadd.f32 %v490_v60, %v481_v53  ;;  %v505_v16 = vstv %s1614_s3  ;;  %v390_v54 = vadd.f32 %v389_v21, %v372_v4 }
  0x74   : > { %s1642_s12 = sld [smem:[#allocation2 + $0x78]]  ;;  %v509_v17 = vstv %s1619_s4  ;;  %v497_v24 = vadd.f32 %v496_v5, %v487_v2  ;;  %v506_v31 = vmul.f32 %v1047_v3, %v505_v16  ;;  %v1062_v2 = vld [vmem:[%s1244_s22 + $0xd0] sm:$0xff]  ;;  %v398_v46 = vadd.f32 %v397_v48, %v380_v8 }
  0x75   : > { %s1646_s13 = sld [smem:[#allocation2 + $0x19]]  ;;  %v515_v18 = vstv %s1623_s5  ;;  %v510_v25 = vmul.f32 %v1047_v3, %v509_v17  ;;  %v501_v26 = vadd.f32 %v500_v27, %v491_v12  ;;  %v407_v63 = vmul.f32 %v1349_v62, %v406_v51  ;;  %v1065_v17 = vld [vmem:[%s1244_s22 + $0xd8] sm:$0xff] }
  0x76   : > { %s1650_s14 = sld [smem:[#allocation2 + $0x79]]  ;;  %v516_v9 = vmul.f32 %v1050_v11, %v515_v18  ;;  %v519_v28 = vstv %s1627_s6  ;;  %v507_v35 = vadd.f32 %v506_v31, %v497_v24  ;;  %v415_v3 = vmul.f32 %v1349_v62, %v414_v52 }
  0x77   : > { %s1653_s15 = sld [smem:[#allocation2 + $0x1a]]  ;;  %v525_v29 = vstv %s1632_s7  ;;  %v520_v34 = vmul.f32 %v1050_v11, %v519_v28  ;;  %v511_v38 = vadd.f32 %v510_v25, %v501_v26  ;;  %v424_v18 = vstv %s1561_s18  ;;  %v1068_v25 = vld [vmem:[%s1244_s22 + $0xe0] sm:$0xff] }
  0x78   : > { %s1656_s19 = sld [smem:[#allocation2 + $0x7a]]  ;;  %v526_v15 = vmul.f32 %v1053_v7, %v525_v29  ;;  %v529_v36 = vstv %s1637_s8  ;;  %v517_v19 = vadd.f32 %v516_v9, %v507_v35  ;;  %v408_v21 = vadd.f32 %v407_v63, %v390_v54 }
  0x79   : > { %s1660_s0 = sld [smem:[#allocation2 + $0x1b]]  ;;  %v530_v40 = vmul.f32 %v1053_v7, %v529_v36  ;;  %v535_v42 = vstv %s1639_s11  ;;  %v521_v53 = vadd.f32 %v520_v34, %v511_v38  ;;  %v432_v7 = vstv %s1577_s23 }
  0x7a   : > { %s1664_s16 = sld [smem:[#allocation2 + $0x7b]]  ;;  %v539_v44 = vstv %s1642_s12  ;;  %v536_v39 = vmul.f32 %v1056_v32, %v535_v42  ;;  %v527_v58 = vadd.f32 %v526_v15, %v517_v19  ;;  %v416_v24 = vadd.f32 %v415_v3, %v398_v46  ;;  %v1074_v3 = vld [vmem:[%s1244_s22 + $0xf0] sm:$0xff] }
  0x7b   : > { %s1668_s20 = sld [smem:[#allocation2 + $0x1c]]  ;;  %v545_v50 = vstv %s1646_s13  ;;  %v540_v56 = vmul.f32 %v1056_v32, %v539_v44  ;;  %v531_v23 = vadd.f32 %v530_v40, %v521_v53  ;;  %v433_v35 = vmul.f32 %v1360_v10, %v432_v7 }
  0x7c   : > { %s1673_s21 = sld [smem:[#allocation2 + $0x7c]]  ;;  %v546_v0 = vmul.f32 %v1059_v45, %v545_v50  ;;  %v549_v59 = vstv %s1650_s14  ;;  %v537_v5 = vadd.f32 %v536_v39, %v527_v58  ;;  %v425_v53 = vmul.f32 %v1360_v10, %v424_v18 }
  0x7d   : > { %s1676_s1 = sld [smem:[#allocation2 + $0x1d]]  ;;  %v555_v60 = vstv %s1653_s15  ;;  %v541_v27 = vadd.f32 %v540_v56, %v531_v23  ;;  %v550_v11 = vmul.f32 %v1059_v45, %v549_v59  ;;  %v1071_v45 = vld [vmem:[%s1244_s22 + $0xe8] sm:$0xff]  ;;  %v1759_v56 = vadd.f32 %v433_v35, %v416_v24  ;;  %v1128_v24 = vld [vmem:[%s1244_s22 + $0x180] sm:$0xff] }
  0x7e   : > { %s1682_s9 = sld [smem:[#allocation2 + $0x7d]]  ;;  %v556_v12 = vmul.f32 %v1062_v2, %v555_v60  ;;  %v559_v4 = vstv %s1656_s19  ;;  %v547_v16 = vadd.f32 %v546_v0, %v537_v5  ;;  %v1077_v5 = vld [vmem:[%s1244_s22 + $0xf8] sm:$0xff] }
  0x7f   : > { %s1685_s24 = sld [smem:[#allocation2 + $0x1e]]  ;;  %v565_v8 = vstv %s1660_s0  ;;  %v560_v31 = vmul.f32 %v1062_v2, %v559_v4  ;;  %v551_v9 = vadd.f32 %v550_v11, %v541_v27 }
  0x80   : > { %s1690_s25 = sld [smem:[#allocation2 + $0x7e]]  ;;  %v569_v62 = vstv %s1664_s16  ;;  %v557_v28 = vadd.f32 %v556_v12, %v547_v16  ;;  %v566_v29 = vmul.f32 %v1065_v17, %v565_v8  ;;  %v445_v12 = vrot.slane %v1759_v56, 1  ;;  %v1146_v56 = vld [vmem:[%s1244_s22 + $0x1c8] sm:$0xff] }
  0x81   : > { %s1693_s26 = sld [smem:[#allocation2 + $0x1f]]  ;;  %v575_v26 = vstv %s1668_s20  ;;  %v570_v34 = vmul.f32 %v1065_v17, %v569_v62 }
  0x82   : > { %s1698_s27 = sld [smem:[#allocation2 + $0x7f]]  ;;  %v576_v38 = vmul.f32 %v1068_v25, %v575_v26  ;;  %v579_v40 = vstv %s1673_s21  ;;  %v567_v51 = vadd.f32 %v566_v29, %v557_v28  ;;  %v1132_v28 = vld [vmem:[%s1244_s22 + $0x190] sm:$0xff] }
  0x83   : > { %s1702_s28 = sld [smem:[#allocation2 + $0x30]]  ;;  %v585_v48 = vstv %s1676_s1 }
  0x84   : > { %s1706_s29 = sld [smem:[#allocation2 + $0x31]]  ;;  %v586_v0 = vmul.f32 %v1071_v45, %v585_v48  ;;  %v589_v59 = vstv %s1682_s9  ;;  %v577_v63 = vadd.f32 %v576_v38, %v567_v51 }
  0x85   : > { %s1711_s30 = sld [smem:[#allocation2 + $0x32]]  ;;  %v590_v16 = vmul.f32 %v1071_v45, %v589_v59 }
  0x86   : > { %s1713_s3 = sld [smem:[#allocation2 + $0x33]]  ;;  %v599_v54 = vstv %s1690_s25  ;;  %v587_v26 = vadd.f32 %v586_v0, %v577_v63 }
  0x87   : > { %s1717_s2 = sld [smem:[#allocation2 + $0x34]]  ;;  %v605_v23 = vstv %s1693_s26 }
  0x88   : > { %s1720_s17 = sld [smem:[#allocation2 + $0x35]]  ;;  %v1787_v62 = vmul.f32 %v1077_v5, %v605_v23  ;;  %v1140_v23 = vld [vmem:[%s1244_s22 + $0x1b0] sm:$0xff] }
  0x89   : > { %s1724_s4 = sld [smem:[#allocation2 + $0x36]]  ;;  %v620_v32 = vstv %s1702_s28 }
  0x8a   : > { %s1729_s5 = sld [smem:[#allocation2 + $0x37]]  ;;  %v621_v15 = vmul.f32 %v1381_v33, %v620_v32  ;;  %v628_v36 = vstv %s1706_s29  ;;  %v561_v33 = vadd.f32 %v560_v31, %v551_v9  ;;  %v1130_v31 = vld [vmem:[%s1244_s22 + $0x188] sm:$0xff] }
  0x8b   : > { %s1733_s6 = sld [smem:[#allocation2 + $0x38]]  ;;  %v629_v42 = vmul.f32 %v1387_v37, %v628_v36  ;;  %v638_v44 = vstv %s1711_s30  ;;  %v1134_v36 = vld [vmem:[%s1244_s22 + $0x198] sm:$0xff] }
  0x8c   : > { %s1736_s18 = sld [smem:[#allocation2 + $0x39]]  ;;  %v639_v19 = vmul.f32 %v1394_v43, %v638_v44  ;;  %v648_v39 = vstv %s1713_s3  ;;  %v580_v43 = vmul.f32 %v1068_v25, %v579_v40  ;;  %v571_v46 = vadd.f32 %v570_v34, %v561_v33  ;;  %s953_s3 = sshll.u32 %s1882_s10, 3 }
  0x8d   : > { %s1741_s23 = sld [smem:[#allocation2 + $0x3a]]  ;;  %v658_v50 = vstv %s1717_s2  ;;  %v630_v52 = vadd.f32 %v629_v42, %v621_v15  ;;  %v649_v37 = vmul.f32 %v1401_v47, %v648_v39  ;;  %v595_v47 = vstv %s1685_s24 }
  0x8e   : > { %s1746_s7 = sld [smem:[#allocation2 + $0x3b]]  ;;  %v668_v58 = vstv %s1720_s17  ;;  %v659_v60 = vmul.f32 %v1413_v57, %v658_v50  ;;  %v426_v57 = vadd.f32 %v425_v53, %v408_v21  ;;  %v596_v7 = vmul.f32 %v1074_v3, %v595_v47 }
  0x8f   : > { %s1753_s8 = sld [smem:[#allocation2 + $0x40]]  ;;  %v640_v2 = vadd.f32 %v639_v19, %v630_v52  ;;  %v678_v10 = vstv %s1724_s4  ;;  %v669_v11 = vmul.f32 %v1421_v1, %v668_v58  ;;  %v600_v1 = vmul.f32 %v1074_v3, %v599_v54  ;;  %v1136_v19 = vld [vmem:[%s1244_s22 + $0x1a0] sm:$0xff] }
  0x90   : > { %s1756_s11 = sld [smem:[#allocation2 + $0x41]]  ;;  %v688_v4 = vstv %s1729_s5  ;;  %v679_v8 = vmul.f32 %v1430_v13, %v678_v10  ;;  %v609_v21 = vstv %s1698_s27  ;;  %v581_v25 = vadd.f32 %v580_v43, %v571_v46  ;;  %v1138_v43 = vld [vmem:[%s1244_s22 + $0x1a8] sm:$0xff] }
  0x91   : > { %s1762_s12 = sld [smem:[#allocation2 + $0x42]]  ;;  %v650_v27 = vadd.f32 %v649_v37, %v640_v2  ;;  %v698_v18 = vstv %s1733_s6  ;;  %v689_v9 = vmul.f32 %v1439_v22, %v688_v4  ;;  %v610_v37 = vmul.f32 %v1077_v5, %v609_v21  ;;  %v1142_v4 = vld [vmem:[%s1244_s22 + $0x1b8] sm:$0xff]  ;;  %v1144_v21 = vld [vmem:[%s1244_s22 + $0x1c0] sm:$0xff] }
  0x92   : > { %s1766_s13 = sld [smem:[#allocation2 + $0x43]]  ;;  %v699_v32 = vmul.f32 %v1447_v30, %v698_v18  ;;  %v708_v35 = vstv %s1736_s18  ;;  %v591_v52 = vadd.f32 %v590_v16, %v581_v25  ;;  %v597_v47 = vadd.f32 %v596_v7, %v587_v26 }
  0x93   : > { %s1772_s14 = sld [smem:[#allocation2 + $0x44]]  ;;  %v660_v17 = vadd.f32 %v659_v60, %v650_v27  ;;  %v718_v44 = vstv %s1741_s23  ;;  %v709_v50 = vmul.f32 %v1455_v41, %v708_v35 }
  0x94   : > { %s1777_s15 = sld [smem:[#allocation2 + $0x3c]]  ;;  %v728_v53 = vstv %s1746_s7  ;;  %v719_v59 = vmul.f32 %v1460_v49, %v718_v44  ;;  %v601_v27 = vadd.f32 %v600_v1, %v591_v52  ;;  %v607_v1 = vadd.f32 %v1787_v62, %v597_v47 }
  0x95   : > { %s1781_s19 = sld [smem:[#allocation2 + $0x45]]  ;;  %v670_v13 = vadd.f32 %v669_v11, %v660_v17  ;;  %v784_v34 = vstv %s1753_s8  ;;  %v729_v63 = vmul.f32 %v1465_v55, %v728_v53 }
  0x96   : > { %s1785_s0 = sld [smem:[#allocation2 + $0x3d]]  ;;  %v789_v15 = vstv %s1756_s11  ;;  %v785_v40 = vmul.f32 %v1128_v24, %v784_v34  ;;  %v1148_v34 = vld [vmem:[%s1244_s22 + $0x1d0] sm:$0xff] }
  0x97   : > { %s1792_s16 = sld [smem:[#allocation2 + $0x46]]  ;;  %v680_v38 = vadd.f32 %v679_v8, %v670_v13  ;;  %v790_v42 = vmul.f32 %v1130_v31, %v789_v15  ;;  %v795_v22 = vstv %s1762_s12  ;;  %v611_v13 = vadd.f32 %v610_v37, %v601_v27 }
  0x98   : > { %s1795_s20 = sld [smem:[#allocation2 + $0x3e]]  ;;  %v796_v45 = vmul.f32 %v1132_v28, %v795_v22  ;;  %v801_v48 = vstv %s1766_s13 }
  0x99   : > { %s1803_s21 = sld [smem:[#allocation2 + $0x47]]  ;;  %v807_v39 = vstv %s1772_s14  ;;  %v690_v30 = vadd.f32 %v689_v9, %v680_v38  ;;  %v791_v33 = vadd.f32 %v790_v42, %v785_v40  ;;  %v802_v51 = vmul.f32 %v1134_v36, %v801_v48  ;;  %v1150_v42 = vld [vmem:[%s1244_s22 + $0x1d8] sm:$0xff] }
  0x9a   : > { %s1810_s1 = sld [smem:[#allocation2 + $0x48]]  ;;  %v808_v2 = vmul.f32 %v1136_v19, %v807_v39  ;;  %v738_v54 = vstv %s1777_s15  ;;  %v614_v38 = vrot.slane %v611_v13, 1  ;;  %v1152_v39 = vld [vmem:[%s1244_s22 + $0x1e0] sm:$0xff] }
  0x9b   : > { %s1813_s9 = sld [smem:[#allocation2 + $0x3f]]  ;;  %v813_v58 = vstv %s1781_s19  ;;  %v700_v0 = vadd.f32 %v699_v32, %v690_v30  ;;  %v797_v41 = vadd.f32 %v796_v45, %v791_v33  ;;  %v739_v17 = vmul.f32 %v1470_v61, %v738_v54 }
  0x9c   : > { %s1818_s24 = sld [smem:[#allocation2 + $0x49]]  ;;  %v814_v5 = vmul.f32 %v1138_v43, %v813_v58  ;;  %v748_v49 = vstv %s1785_s0  ;;  %v1156_v58 = vld [vmem:[%s1244_s22 + $0x1f0] sm:$0xff] }
  0x9d   : > { %v819_v10 = vstv %s1792_s16  ;;  %s1824_s25 = sld [smem:[#allocation2 + $0x4a]]  ;;  %v710_v46 = vadd.f32 %v709_v50, %v700_v0  ;;  %v803_v3 = vadd.f32 %v802_v51, %v797_v41  ;;  %v749_v25 = vmul.f32 %v1476_v6, %v748_v49  ;;  %v1154_v51 = vld [vmem:[%s1244_s22 + $0x1e8] sm:$0xff] }
  0x9e   : > { %v758_v11 = vstv %s1795_s20  ;;  %s1831_s26 = sld [smem:[#allocation2 + $0x4b]]  ;;  %v820_v18 = vmul.f32 %v1140_v23, %v819_v10 }
  0x9f   : > { %v825_v16 = vstv %s1803_s21  ;;  %v809_v8 = vadd.f32 %v808_v2, %v803_v3  ;;  %s1839_s27 = sld [smem:[#allocation2 + $0x4c]]  ;;  %v759_v9 = vmul.f32 %v1480_v14, %v758_v11  ;;  %v1158_v2 = vld [vmem:[%s1244_s22 + $0x1f8] sm:$0xff] }
  0xa0   : > { %v831_v24 = vstv %s1810_s1  ;;  %v826_v26 = vmul.f32 %v1142_v4, %v825_v16  ;;  %s1846_s28 = sld [smem:[#allocation2 + $0x4d]] }
  0xa1   : > { %v815_v61 = vadd.f32 %v814_v5, %v809_v8  ;;  %v768_v28 = vstv %s1813_s9  ;;  %v832_v35 = vmul.f32 %v1144_v21, %v831_v24  ;;  %s1850_s29 = sld [smem:[#allocation2 + $0x4e]] }
  0xa2   : > { %v769_v40 = vmul.f32 %v1484_v20, %v768_v28  ;;  %s1159_s30 = sld [smem:[#allocation2 + $0x4f]] }
  0xa3   : > { %v821_v32 = vadd.f32 %v820_v18, %v815_v61  ;;  %v843_v6 = vstv %s1824_s25  ;;  %s1879_s4 = sld [smem:[#allocation8_spill]] }
  0xa4   : > { %v849_v22 = vstv %s1831_s26  ;;  %v844_v19 = vmul.f32 %v1148_v34, %v843_v6 }
  0xa5   : > { %v827_v14 = vadd.f32 %v826_v26, %v821_v32  ;;  %v855_v30 = vstv %s1839_s27  ;;  %v850_v33 = vmul.f32 %v1150_v42, %v849_v22 }
  0xa6   : > { %v861_v52 = vstv %s1846_s28  ;;  %v856_v43 = vmul.f32 %v1152_v39, %v855_v30 }
  0xa7   : > { %v833_v48 = vadd.f32 %v832_v35, %v827_v14  ;;  %v867_v0 = vstv %s1850_s29  ;;  %v862_v41 = vmul.f32 %v1154_v51, %v861_v52 }
  0xa8   : > { %v868_v23 = vmul.f32 %v1156_v58, %v867_v0 }
  0xa9   : > { %s155_s5 = scalar_lea.vmem %s1879_s4, %s953_s3 }
  0xb0   : > { %v441_v29 = vpop.permute.xlu0 %440 }
  0xb1   : > { %v443_v60 = vadd.f32 %v441_v29, %v426_v57  ;;  %v720_v57 = vadd.f32 %v719_v59, %v710_v46 }
  0xb3   : > { %v447_v7 = vadd.f32 %v445_v12, %v443_v60  ;;  %v730_v31 = vadd.f32 %v729_v63, %v720_v57  ;;  %v837_v12 = vstv %s1818_s24  ;;  %v873_v60 = vstv %s1159_s30 }
  0xb4   : > { %v838_v36 = vmul.f32 %v1146_v56, %v837_v12  ;;  %v874_v63 = vmul.f32 %v1158_v2, %v873_v60 }
  0xb5   : > { %v740_v29 = vadd.f32 %v739_v17, %v730_v31 }
  0xb6   : > { %v839_v50 = vadd.f32 %v838_v36, %v833_v48 }
  0xb7   : > { %v750_v15 = vadd.f32 %v749_v25, %v740_v29 }
  0xb8   : > { %v845_v20 = vadd.f32 %v844_v19, %v839_v50 }
  0xb9   : > { %v760_v45 = vadd.f32 %v759_v9, %v750_v15 }
  0xba   : > { %v851_v59 = vadd.f32 %v850_v33, %v845_v20 }
  0xbb   : > { %v770_v53 = vadd.f32 %v769_v40, %v760_v45 }
  0xbc   : > { %v857_v54 = vadd.f32 %v856_v43, %v851_v59 }
  0xbe   : > { %v863_v46 = vadd.f32 %v862_v41, %v857_v54 }
  0xbf   : > { %v451_v55 = vpop.permute.xlu0 %450 }
  0xc0   : > { %v453_v62 = vadd.f32 %v451_v55, %v447_v7  ;;  %v869_v5 = vadd.f32 %v868_v23, %v863_v46 }
  0xc2   : > { %v612_v44 = vadd.f32 %v607_v1, %v453_v62  ;;  %v875_v27 = vadd.f32 %v874_v63, %v869_v5 }
  0xc4   : > { %v616_v37 = vadd.f32 %v614_v38, %v612_v44 }
  0xc6   : > { %v775_v47 = vadd.f32 %v770_v53, %v616_v37 }
  0xcd   : > { %v778_v10 = vpop.permute.xlu1 %777 }
  0xce   : > { %v780_v3 = vadd.f32 %v778_v10, %v775_v47 }
  0xd0   : > { %v876_v49 = vadd.f32 %v875_v27, %v780_v3 }
  0xd2   : > { %878 = vst.msk [vmem:[%s155_s5] sm:$0x7f] %vm877_vm0, %v876_v49 }
  0xd3 PF: > { %s1880_s22 = sld [smem:[#allocation5_spill]] }
  0xd9   : > { %s13_s9 = sadd.s32 1, %s1880_s22  }
  0xda   : > { %p10_p7 = scmp.ge.s32.totalorder %s13_s9, 4  }
  0xdc   :  { %12 = sbr.rel (!%p10_p7) target bundleno = 5 (0x5), region = 126 }
  0xe1   :  { %898 = vsyncpa [#allocation3], 1 }
  0xe2   :  { %900 = vsyncpa [#allocation3 + $0x1], 1 }

</bundles_post_ra>
